<compile_context>
chip_gen: v7x
topology: tpu7x:2x2x1
jax: 0.10.0
libtpu: 0.0.40
codegen_flags: <defaults>
</compile_context>

<pallas_src>
import functools

import jax
import jax.numpy as jnp
import numpy as np
from jax import lax
from jax.experimental import pallas as pl
from jax.experimental.pallas import tpu as pltpu

FEAT_DIM = 64           # channels of `feat` (fixed by the module)
HID = 32                # fuse hidden == mask_proj hidden == feat_dim // 2
TAP_SLOT = 8            # sublane-aligned channel slots per tap for the fused small conv
LANE = 128


def _gelu_exact(x):
    # Exact (erf-based) GELU, matching torch.nn.GELU() default.
    # erf via Abramowitz-Stegun 7.1.26 (|err| < 1.5e-7), built only from ops
    # guaranteed to lower on the TPU VPU/EUP (exp, mul, add, where, div).
    # The divide is kept exact (not pl.reciprocal(approx=True)): this output
    # feeds a 288-wide conv, so approximation error would eat the 1e-3 budget,
    # and the divide is on a (32, P) tensor — negligible next to the matmuls.
    z = x * np.float32(1.0 / np.sqrt(2.0))
    az = jnp.abs(z)
    t = 1.0 / (1.0 + np.float32(0.3275911) * az)
    poly = ((((np.float32(1.061405429) * t - np.float32(1.453152027)) * t
              + np.float32(1.421413741)) * t - np.float32(0.284496736)) * t
            + np.float32(0.254829592)) * t
    erf_abs = 1.0 - poly * jnp.exp(-az * az)
    erf_z = jnp.where(z >= 0.0, erf_abs, -erf_abs)
    return 0.5 * x * (1.0 + erf_z)


def _fill_taps(col_ref, x, cin, width, tapm):
    """Write the 9-tap im2col stack of `x` into col_ref[0:9*cin] in ONE store pass.

    x: (cin, P) activation, P = padded H*W pixels on the lane axis (cin mult. of 8).
    Row block [k*cin:(k+1)*cin] holds x lane-shifted by tap k and multiplied by the
    host-precomputed border mask, so out-of-image taps are exact zeros.  The shift
    is pltpu.roll (XLU): shifted[:, q] = x[:, (q+off) % P]; wrapped values are
    don't-cares because the mask zeroes every invalid position, and every valid
    (mask==1) position indexes strictly inside [0, H*W), so the lane padding
    never leaks into valid outputs.
    """
    p = x.shape[-1]
    for k in range(9):
        ky, kx = divmod(k, 3)
        off = (ky - 1) * width + (kx - 1)
        if off == 0:
            col_ref[k * cin:(k + 1) * cin, :] = x        # centre tap: always valid
        else:
            shifted = pltpu.roll(x, (-off) % p, axis=1)
            col_ref[k * cin:(k + 1) * cin, :] = shifted * tapm[k:k + 1, :]


def _spg_kernel(feat_ref, mask_ref, tmask_ref,
                wa_ref, ba_ref, w2_ref, b2_ref,
                wb_ref, bb_ref, aw_ref, ab_ref,
                out_ref, x8_ref, col_ref, *, width):
    p = feat_ref.shape[-1]

    feat = feat_ref[...].astype(jnp.float32)         # (64, P)  pixels on lanes
    msk = mask_ref[...].astype(jnp.float32)          # (1, P)
    tapm = tmask_ref[...]                            # (9, P)

    # ---- channel statistics (sublane reductions) packed into an 8-row slab ----
    # Rows 3..7 carry zero weight columns; they are zeroed every step so no
    # stale scratch can reach the MXU (scratch is uninitialized and may be
    # core-local under megacore sharding).
    x8_ref[0:1, :] = jnp.mean(feat, axis=0, keepdims=True)
    x8_ref[1:2, :] = jnp.max(feat, axis=0, keepdims=True)
    x8_ref[2:3, :] = msk
    x8_ref[3:8, :] = jnp.zeros((5, p), jnp.float32)

    # ---- fused fuse.conv1 (2->32) + mask_proj.conv1 (1->32): one matmul ----
    _fill_taps(col_ref, x8_ref[...], TAP_SLOT, width, tapm)           # rows 0..71
    ha = jnp.dot(wa_ref[...], col_ref[0:9 * TAP_SLOT, :],
                 preferred_element_type=jnp.float32) + ba_ref[...]    # (64, P)
    h_fuse = jnp.maximum(ha[0:HID], 0.0)             # ReLU branch (fuse)
    m1 = _gelu_exact(ha[HID:2 * HID])                # GELU branch (mask_proj)

    # ---- fuse.conv2 (1x1, 32->1) + sigmoid: tiny MXU matmul, row 0 is real ----
    s = jnp.dot(w2_ref[...], h_fuse, preferred_element_type=jnp.float32)   # (8, P)
    sw = 1.0 / (1.0 + jnp.exp(-(s[0:1, :] + b2_ref[...])))                 # (1, P)

    # ---- mask_proj.conv2 (3x3, 32->64): one (64,288)@(288,P) matmul ----
    _fill_taps(col_ref, m1, HID, width, tapm)                          # rows 0..287
    m2 = jnp.dot(wb_ref[...], col_ref[...],
                 preferred_element_type=jnp.float32) + bb_ref[...]     # (64, P)

    # ---- prompt = mask_feat * spatial_weight ; adjust_conv (1x1) ----
    prompt = m2 * sw
    out = jnp.dot(aw_ref[...], prompt, preferred_element_type=jnp.float32) + ab_ref[...]
    out_ref[...] = out.astype(out_ref.dtype)


@functools.lru_cache(maxsize=None)
def _tap_masks(H, W, P_pad):
    """(9, P_pad) 0/1 masks: tap k valid iff the (dy,dx)-shifted pixel is inside."""
    y, x = np.mgrid[0:H, 0:W]
    masks = []
    for ky in range(3):
        for kx in range(3):
            valid = ((y + ky - 1 >= 0) & (y + ky - 1 < H) &
                     (x + kx - 1 >= 0) & (x + kx - 1 < W))
            masks.append(valid.reshape(-1))
    m = np.zeros((9, P_pad), np.float32)
    m[:, :H * W] = np.stack(masks, 0).astype(np.float32)
    return jnp.asarray(m)


def pack_params(fuse_w1, fuse_b1, fuse_w2, fuse_b2,
                mp_w1, mp_b1, mp_w2, mp_b2, adj_w, adj_b):
    """Pack PyTorch-layout (OIHW) weights into the kernel's matmul matrices."""
    fuse_w1 = np.asarray(fuse_w1); fuse_w2 = np.asarray(fuse_w2)
    mp_w1 = np.asarray(mp_w1); mp_w2 = np.asarray(mp_w2)
    adj_w = np.asarray(adj_w)

    # Fused small conv: rows 0:32 = fuse.conv1 (inputs avg,max), rows 32:64 =
    # mask_proj.conv1 (input mask).  Columns are 9 taps x 8 padded channel slots
    # [avg, max, mask, 0, 0, 0, 0, 0].
    wa = np.zeros((2 * HID, 9 * TAP_SLOT), np.float32)
    for k in range(9):
        ky, kx = divmod(k, 3)
        wa[0:HID, k * TAP_SLOT + 0] = fuse_w1[:, 0, ky, kx]
        wa[0:HID, k * TAP_SLOT + 1] = fuse_w1[:, 1, ky, kx]
        wa[HID:2 * HID, k * TAP_SLOT + 2] = mp_w1[:, 0, ky, kx]
    ba = np.concatenate([np.asarray(fuse_b1), np.asarray(mp_b1)]).reshape(2 * HID, 1)
    ba = ba.astype(np.float32)

    # fuse.conv2 (1x1) as a sublane-padded (8, 32) matmul LHS (row 0 is real).
    w2 = np.zeros((TAP_SLOT, HID), np.float32)
    w2[0, :] = fuse_w2.reshape(HID)
    b2 = np.asarray(fuse_b2).reshape(1, 1).astype(np.float32)

    wb = np.zeros((FEAT_DIM, 9 * HID), np.float32)
    for k in range(9):
        ky, kx = divmod(k, 3)
        wb[:, k * HID:(k + 1) * HID] = mp_w2[:, :, ky, kx]
    bb = np.asarray(mp_b2).reshape(FEAT_DIM, 1).astype(np.float32)

    aw = adj_w.reshape(FEAT_DIM, FEAT_DIM).astype(np.float32)
    ab = np.asarray(adj_b).reshape(FEAT_DIM, 1).astype(np.float32)

    return tuple(jnp.asarray(a) for a in (wa, ba, w2, b2, wb, bb, aw, ab))


def spatial_prompt_generator(feat_nchw, mask_nchw, packed_params):
    """feat_nchw: (B, 64, H, W), mask_nchw: (B, 1, H, W).  Returns (B, 64, H, W)."""
    B, C, H, W = feat_nchw.shape
    assert C == FEAT_DIM
    P = H * W
    P_pad = ((P + LANE - 1) // LANE) * LANE          # lane-dense (unmasked) stores

    # Free reshapes (no transposes): NCHW with trailing spatial dims merged is
    # exactly the kernel's planar-flat layout.  Zero-pad the pixel axis so all
    # kernel stores are full-lane vst; padded lanes are sliced away afterwards.
    feat = feat_nchw.reshape(B, C, P)
    mask = mask_nchw.reshape(B, 1, P)
    if P_pad != P:
        feat = jnp.pad(feat, ((0, 0), (0, 0), (0, P_pad - P)))
        mask = jnp.pad(mask, ((0, 0), (0, 0), (0, P_pad - P)))

    wa, ba, w2, b2, wb, bb, aw, ab = packed_params
    tapm = _tap_masks(H, W, P_pad)                   # cached per (H, W)

    itemsize = jnp.dtype(feat_nchw.dtype).itemsize
    # Generation-aware VMEM budget: double-buffered in/out blocks + constants +
    # im2col/stats scratch + headroom for in-kernel f32 temporaries (feat copy,
    # m1/m2/prompt/out and rolled taps in flight).  One image per grid step.
    consts_bytes = 4 * (9 * P_pad + wa.size + ba.size + w2.size + b2.size
                        + wb.size + bb.size + aw.size + ab.size)
    est = (2 * (C + 1) * P_pad * itemsize            # double-buffered input blocks
           + 2 * C * P_pad * itemsize                # double-buffered output blocks
           + 2 * consts_bytes
           + (9 * HID + TAP_SLOT) * P_pad * 4        # col + stats scratch
           + 12 * C * P_pad * 4)                     # in-kernel temporaries headroom
    vmem_limit = int(min(48 << 20, max(32 << 20, est + (est >> 1))))

    flops = 2 * B * P_pad * (wa.shape[0] * wa.shape[1] + w2.shape[0] * w2.shape[1]
                             + wb.shape[0] * wb.shape[1] + aw.shape[0] * aw.shape[1])
    cost = pl.CostEstimate(
        flops=int(flops),
        transcendentals=int(B * P_pad * (2 * HID + 2)),
        bytes_accessed=int(B * (2 * C + 1) * P_pad * itemsize + consts_bytes))

    kern = functools.partial(_spg_kernel, width=W)
    full2 = lambda b: (0, 0)

    out = pl.pallas_call(
        kern,
        out_shape=jax.ShapeDtypeStruct((B, C, P_pad), feat_nchw.dtype),
        grid_spec=pltpu.PrefetchScalarGridSpec(
            num_scalar_prefetch=0,
            # One image per grid step: bounds live ranges to one image's
            # temporaries, gives the DMA pipeline >= 2 steps, and lets v7x's
            # two TensorCores split the batch axis.
            grid=(B,),
            in_specs=[
                pl.BlockSpec((None, C, P_pad), lambda b: (b, 0, 0)),
                pl.BlockSpec((None, 1, P_pad), lambda b: (b, 0, 0)),
                pl.BlockSpec(tapm.shape, full2),
                pl.BlockSpec(wa.shape, full2),
                pl.BlockSpec(ba.shape, full2),
                pl.BlockSpec(w2.shape, full2),
                pl.BlockSpec(b2.shape, full2),
                pl.BlockSpec(wb.shape, full2),
                pl.BlockSpec(bb.shape, full2),
                pl.BlockSpec(aw.shape, full2),
                pl.BlockSpec(ab.shape, full2),
            ],
            out_specs=pl.BlockSpec((None, C, P_pad), lambda b: (b, 0, 0)),
            scratch_shapes=[
                pltpu.VMEM((TAP_SLOT, P_pad), jnp.float32),   # [avg,max,mask,0..] slab
                pltpu.VMEM((9 * HID, P_pad), jnp.float32),    # im2col (reused by both convs)
            ]),
        compiler_params=pltpu.CompilerParams(
            dimension_semantics=("parallel",),
            vmem_limit_bytes=vmem_limit),
        cost_estimate=cost,
    )(feat, mask, tapm, wa, ba, w2, b2, wb, bb, aw, ab)

    if P_pad != P:
        out = out[:, :, :P]
    return out.reshape(B, C, H, W)


# ---------------- pure-JAX reference (for correctness check) ----------------
def _conv_ref(x, w_oihw, b, pad):
    y = lax.conv_general_dilated(
        x, w_oihw, window_strides=(1, 1), padding=[(pad, pad), (pad, pad)],
        dimension_numbers=("NCHW", "OIHW", "NCHW"))
    return y + b.reshape(1, -1, 1, 1)


def reference(feat, mask, raw_params):
    fw1, fb1, fw2, fb2, mw1, mb1, mw2, mb2, aw, ab = raw_params
    avg = jnp.mean(feat, axis=1, keepdims=True)
    mx = jnp.max(feat, axis=1, keepdims=True)
    stats = jnp.concatenate([avg, mx], axis=1)
    sw = jax.nn.sigmoid(
        _conv_ref(jax.nn.relu(_conv_ref(stats, fw1, fb1, 1)), fw2, fb2, 0))
    m = jax.nn.gelu(_conv_ref(mask, mw1, mb1, 1), approximate=False)
    m = _conv_ref(m, mw2, mb2, 1)
    prompt = m * sw
    return _conv_ref(prompt, aw, ab, 0)


if __name__ == "__main__":
    B, H, W = 2, 16, 16
    C = FEAT_DIM

    key = jax.random.PRNGKey(0)
    keys = jax.random.split(key, 12)
    feat = jax.random.normal(keys[0], (B, C, H, W), jnp.float32)
    mask = (jax.random.uniform(keys[1], (B, 1, H, W)) > 0.5).astype(jnp.float32)

    def init(k, shape, scale=0.1):
        return (scale * jax.random.normal(k, shape)).astype(jnp.float32)

    # Deterministic synthetic parameters in PyTorch (OIHW) layout.
    fw1 = init(keys[2], (HID, 2, 3, 3));  fb1 = init(keys[3], (HID,))
    fw2 = init(keys[4], (1, HID, 1, 1));  fb2 = init(keys[5], (1,))
    mw1 = init(keys[6], (HID, 1, 3, 3));  mb1 = init(keys[7], (HID,))
    mw2 = init(keys[8], (C, HID, 3, 3));  mb2 = init(keys[9], (C,))
    aw = init(keys[10], (C, C, 1, 1));    ab = init(keys[11], (C,))
    raw = (fw1, fb1, fw2, fb2, mw1, mb1, mw2, mb2, aw, ab)

    packed = pack_params(*(np.asarray(p) for p in raw))

    out = spatial_prompt_generator(feat, mask, packed)
    out = jax.block_until_ready(out)

    ref = reference(feat, mask, raw)
    np.testing.assert_allclose(np.asarray(out), np.asarray(ref),
                               rtol=1e-3, atol=1e-3)
    print("KERNEL_OK")
</pallas_src>

<mosaic_0001>
module attributes {stable_mosaic.version = 11 : i64} {
  func.func @_spg_kernel(%arg0: i32, %arg1: memref<1x64x256xf32, #tpu.memory_space<vmem>>, %arg2: memref<1x1x256xf32, #tpu.memory_space<vmem>>, %arg3: memref<9x256xf32, #tpu.memory_space<vmem>>, %arg4: memref<64x72xf32, #tpu.memory_space<vmem>>, %arg5: memref<64x1xf32, #tpu.memory_space<vmem>>, %arg6: memref<8x32xf32, #tpu.memory_space<vmem>>, %arg7: memref<1x1xf32, #tpu.memory_space<vmem>>, %arg8: memref<64x288xf32, #tpu.memory_space<vmem>>, %arg9: memref<64x1xf32, #tpu.memory_space<vmem>>, %arg10: memref<64x64xf32, #tpu.memory_space<vmem>>, %arg11: memref<64x1xf32, #tpu.memory_space<vmem>>, %arg12: memref<1x64x256xf32, #tpu.memory_space<vmem>>, %arg13: memref<8x256xf32, #tpu.memory_space<vmem>>, %arg14: memref<288x256xf32, #tpu.memory_space<vmem>>) attributes {dimension_semantics = [#tpu.dimension_semantics<parallel>], iteration_bounds = array<i64: 2>, scalar_prefetch = 0 : i64, scratch_operands = 2 : i64, tpu.core_type = #tpu.core_type<tc>, window_params = [{transform_indices = @transform_0, window_bounds = array<i64: 1, 64, 256>}, {transform_indices = @transform_1, window_bounds = array<i64: 1, 1, 256>}, {pipeline_mode = #tpu.pipeline_mode<synchronous>, transform_indices = @transform_2, window_bounds = array<i64: 9, 256>}, {pipeline_mode = #tpu.pipeline_mode<synchronous>, transform_indices = @transform_3, window_bounds = array<i64: 64, 72>}, {pipeline_mode = #tpu.pipeline_mode<synchronous>, transform_indices = @transform_4, window_bounds = array<i64: 64, 1>}, {pipeline_mode = #tpu.pipeline_mode<synchronous>, transform_indices = @transform_5, window_bounds = array<i64: 8, 32>}, {pipeline_mode = #tpu.pipeline_mode<synchronous>, transform_indices = @transform_6, window_bounds = array<i64: 1, 1>}, {pipeline_mode = #tpu.pipeline_mode<synchronous>, transform_indices = @transform_7, window_bounds = array<i64: 64, 288>}, {pipeline_mode = #tpu.pipeline_mode<synchronous>, transform_indices = @transform_8, window_bounds = array<i64: 64, 1>}, {pipeline_mode = #tpu.pipeline_mode<synchronous>, transform_indices = @transform_9, window_bounds = array<i64: 64, 64>}, {pipeline_mode = #tpu.pipeline_mode<synchronous>, transform_indices = @transform_10, window_bounds = array<i64: 64, 1>}, {transform_indices = @transform_11, window_bounds = array<i64: 1, 64, 256>}]} {
    %c0 = arith.constant 0 : index
    %c0_0 = arith.constant 0 : index
    %c0_1 = arith.constant 0 : index
    %0 = vector.load %arg1[%c0, %c0_0, %c0_1] : memref<1x64x256xf32, #tpu.memory_space<vmem>>, vector<1x64x256xf32>
    %1 = vector.shape_cast %0 : vector<1x64x256xf32> to vector<64x256xf32>
    %c0_2 = arith.constant 0 : index
    %c0_3 = arith.constant 0 : index
    %c0_4 = arith.constant 0 : index
    %2 = vector.load %arg2[%c0_2, %c0_3, %c0_4] : memref<1x1x256xf32, #tpu.memory_space<vmem>>, vector<1x1x256xf32>
    %3 = vector.shape_cast %2 : vector<1x1x256xf32> to vector<1x256xf32>
    %c0_5 = arith.constant 0 : index
    %c0_6 = arith.constant 0 : index
    %4 = vector.load %arg3[%c0_5, %c0_6] : memref<9x256xf32, #tpu.memory_space<vmem>>, vector<9x256xf32>
    %cst = arith.constant dense<0.000000e+00> : vector<256xf32>
    %5 = vector.multi_reduction <add>, %1, %cst [0] : vector<64x256xf32> to vector<256xf32>
    %6 = vector.shape_cast %5 : vector<256xf32> to vector<1x256xf32>
    %cst_7 = arith.constant 6.400000e+01 : f32
    %7 = vector.broadcast %cst_7 : f32 to vector<1x256xf32>
    %8 = arith.divf %6, %7 : vector<1x256xf32>
    %c0_8 = arith.constant 0 : index
    %c0_9 = arith.constant 0 : index
    %9 = vector.load %arg13[%c0_8, %c0_9] : memref<8x256xf32, #tpu.memory_space<vmem>>, vector<1x256xf32>
    tpu.vector_store %arg13[%c0_8, %c0_9], %8 {strides = array<i32>} : memref<8x256xf32, #tpu.memory_space<vmem>>, vector<1x256xf32>,
    %cst_10 = arith.constant dense<0xFF800000> : vector<256xf32>
    %10 = vector.multi_reduction <maximumf>, %1, %cst_10 [0] : vector<64x256xf32> to vector<256xf32>
    %11 = vector.shape_cast %10 : vector<256xf32> to vector<1x256xf32>
    %c1 = arith.constant 1 : index
    %c0_11 = arith.constant 0 : index
    %12 = vector.load %arg13[%c1, %c0_11] : memref<8x256xf32, #tpu.memory_space<vmem>>, vector<1x256xf32>
    tpu.vector_store %arg13[%c1, %c0_11], %11 {strides = array<i32>} : memref<8x256xf32, #tpu.memory_space<vmem>>, vector<1x256xf32>,
    %c2 = arith.constant 2 : index
    %c0_12 = arith.constant 0 : index
    %13 = vector.load %arg13[%c2, %c0_12] : memref<8x256xf32, #tpu.memory_space<vmem>>, vector<1x256xf32>
    tpu.vector_store %arg13[%c2, %c0_12], %3 {strides = array<i32>} : memref<8x256xf32, #tpu.memory_space<vmem>>, vector<1x256xf32>,
    %cst_13 = arith.constant 0.000000e+00 : f32
    %14 = vector.broadcast %cst_13 : f32 to vector<5x256xf32>
    %c3 = arith.constant 3 : index
    %c0_14 = arith.constant 0 : index
    %15 = vector.load %arg13[%c3, %c0_14] : memref<8x256xf32, #tpu.memory_space<vmem>>, vector<5x256xf32>
    tpu.vector_store %arg13[%c3, %c0_14], %14 {strides = array<i32>} : memref<8x256xf32, #tpu.memory_space<vmem>>, vector<5x256xf32>,
    %c0_15 = arith.constant 0 : index
    %c0_16 = arith.constant 0 : index
    %16 = vector.load %arg13[%c0_15, %c0_16] : memref<8x256xf32, #tpu.memory_space<vmem>>, vector<8x256xf32>
    %c17_i32 = arith.constant 17 : i32
    %17 = tpu.dynamic_rotate %16 by %c17_i32 dim 1 : vector<8x256xf32>, i32 -> vector<8x256xf32>
    %18 = vector.extract_strided_slice %4 {offsets = [0, 0], sizes = [1, 256], strides = [1, 1]} : vector<9x256xf32> to vector<1x256xf32>
    %19 = vector.broadcast %18 : vector<1x256xf32> to vector<8x256xf32>
    %20 = arith.mulf %17, %19 : vector<8x256xf32>
    %c0_17 = arith.constant 0 : index
    %c0_18 = arith.constant 0 : index
    %21 = vector.load %arg14[%c0_17, %c0_18] : memref<288x256xf32, #tpu.memory_space<vmem>>, vector<8x256xf32>
    tpu.vector_store %arg14[%c0_17, %c0_18], %20 {strides = array<i32>} : memref<288x256xf32, #tpu.memory_space<vmem>>, vector<8x256xf32>,
    %c16_i32 = arith.constant 16 : i32
    %22 = tpu.dynamic_rotate %16 by %c16_i32 dim 1 : vector<8x256xf32>, i32 -> vector<8x256xf32>
    %23 = vector.extract_strided_slice %4 {offsets = [1, 0], sizes = [1, 256], strides = [1, 1]} : vector<9x256xf32> to vector<1x256xf32>
    %24 = vector.broadcast %23 : vector<1x256xf32> to vector<8x256xf32>
    %25 = arith.mulf %22, %24 : vector<8x256xf32>
    %c8 = arith.constant 8 : index
    %c0_19 = arith.constant 0 : index
    %26 = vector.load %arg14[%c8, %c0_19] : memref<288x256xf32, #tpu.memory_space<vmem>>, vector<8x256xf32>
    tpu.vector_store %arg14[%c8, %c0_19], %25 {strides = array<i32>} : memref<288x256xf32, #tpu.memory_space<vmem>>, vector<8x256xf32>,
    %c15_i32 = arith.constant 15 : i32
    %27 = tpu.dynamic_rotate %16 by %c15_i32 dim 1 : vector<8x256xf32>, i32 -> vector<8x256xf32>
    %28 = vector.extract_strided_slice %4 {offsets = [2, 0], sizes = [1, 256], strides = [1, 1]} : vector<9x256xf32> to vector<1x256xf32>
    %29 = vector.broadcast %28 : vector<1x256xf32> to vector<8x256xf32>
    %30 = arith.mulf %27, %29 : vector<8x256xf32>
    %c16 = arith.constant 16 : index
    %c0_20 = arith.constant 0 : index
    %31 = vector.load %arg14[%c16, %c0_20] : memref<288x256xf32, #tpu.memory_space<vmem>>, vector<8x256xf32>
    tpu.vector_store %arg14[%c16, %c0_20], %30 {strides = array<i32>} : memref<288x256xf32, #tpu.memory_space<vmem>>, vector<8x256xf32>,
    %c1_i32 = arith.constant 1 : i32
    %32 = tpu.dynamic_rotate %16 by %c1_i32 dim 1 : vector<8x256xf32>, i32 -> vector<8x256xf32>
    %33 = vector.extract_strided_slice %4 {offsets = [3, 0], sizes = [1, 256], strides = [1, 1]} : vector<9x256xf32> to vector<1x256xf32>
    %34 = vector.broadcast %33 : vector<1x256xf32> to vector<8x256xf32>
    %35 = arith.mulf %32, %34 : vector<8x256xf32>
    %c24 = arith.constant 24 : index
    %c0_21 = arith.constant 0 : index
    %36 = vector.load %arg14[%c24, %c0_21] : memref<288x256xf32, #tpu.memory_space<vmem>>, vector<8x256xf32>
    tpu.vector_store %arg14[%c24, %c0_21], %35 {strides = array<i32>} : memref<288x256xf32, #tpu.memory_space<vmem>>, vector<8x256xf32>,
    %c32 = arith.constant 32 : index
    %c0_22 = arith.constant 0 : index
    %37 = vector.load %arg14[%c32, %c0_22] : memref<288x256xf32, #tpu.memory_space<vmem>>, vector<8x256xf32>
    tpu.vector_store %arg14[%c32, %c0_22], %16 {strides = array<i32>} : memref<288x256xf32, #tpu.memory_space<vmem>>, vector<8x256xf32>,
    %c255_i32 = arith.constant 255 : i32
    %38 = tpu.dynamic_rotate %16 by %c255_i32 dim 1 : vector<8x256xf32>, i32 -> vector<8x256xf32>
    %39 = vector.extract_strided_slice %4 {offsets = [5, 0], sizes = [1, 256], strides = [1, 1]} : vector<9x256xf32> to vector<1x256xf32>
    %40 = vector.broadcast %39 : vector<1x256xf32> to vector<8x256xf32>
    %41 = arith.mulf %38, %40 : vector<8x256xf32>
    %c40 = arith.constant 40 : index
    %c0_23 = arith.constant 0 : index
    %42 = vector.load %arg14[%c40, %c0_23] : memref<288x256xf32, #tpu.memory_space<vmem>>, vector<8x256xf32>
    tpu.vector_store %arg14[%c40, %c0_23], %41 {strides = array<i32>} : memref<288x256xf32, #tpu.memory_space<vmem>>, vector<8x256xf32>,
    %c241_i32 = arith.constant 241 : i32
    %43 = tpu.dynamic_rotate %16 by %c241_i32 dim 1 : vector<8x256xf32>, i32 -> vector<8x256xf32>
    %44 = vector.extract_strided_slice %4 {offsets = [6, 0], sizes = [1, 256], strides = [1, 1]} : vector<9x256xf32> to vector<1x256xf32>
    %45 = vector.broadcast %44 : vector<1x256xf32> to vector<8x256xf32>
    %46 = arith.mulf %43, %45 : vector<8x256xf32>
    %c48 = arith.constant 48 : index
    %c0_24 = arith.constant 0 : index
    %47 = vector.load %arg14[%c48, %c0_24] : memref<288x256xf32, #tpu.memory_space<vmem>>, vector<8x256xf32>
    tpu.vector_store %arg14[%c48, %c0_24], %46 {strides = array<i32>} : memref<288x256xf32, #tpu.memory_space<vmem>>, vector<8x256xf32>,
    %c240_i32 = arith.constant 240 : i32
    %48 = tpu.dynamic_rotate %16 by %c240_i32 dim 1 : vector<8x256xf32>, i32 -> vector<8x256xf32>
    %49 = vector.extract_strided_slice %4 {offsets = [7, 0], sizes = [1, 256], strides = [1, 1]} : vector<9x256xf32> to vector<1x256xf32>
    %50 = vector.broadcast %49 : vector<1x256xf32> to vector<8x256xf32>
    %51 = arith.mulf %48, %50 : vector<8x256xf32>
    %c56 = arith.constant 56 : index
    %c0_25 = arith.constant 0 : index
    %52 = vector.load %arg14[%c56, %c0_25] : memref<288x256xf32, #tpu.memory_space<vmem>>, vector<8x256xf32>
    tpu.vector_store %arg14[%c56, %c0_25], %51 {strides = array<i32>} : memref<288x256xf32, #tpu.memory_space<vmem>>, vector<8x256xf32>,
    %c239_i32 = arith.constant 239 : i32
    %53 = tpu.dynamic_rotate %16 by %c239_i32 dim 1 : vector<8x256xf32>, i32 -> vector<8x256xf32>
    %54 = vector.extract_strided_slice %4 {offsets = [8, 0], sizes = [1, 256], strides = [1, 1]} : vector<9x256xf32> to vector<1x256xf32>
    %55 = vector.broadcast %54 : vector<1x256xf32> to vector<8x256xf32>
    %56 = arith.mulf %53, %55 : vector<8x256xf32>
    %c64 = arith.constant 64 : index
    %c0_26 = arith.constant 0 : index
    %57 = vector.load %arg14[%c64, %c0_26] : memref<288x256xf32, #tpu.memory_space<vmem>>, vector<8x256xf32>
    tpu.vector_store %arg14[%c64, %c0_26], %56 {strides = array<i32>} : memref<288x256xf32, #tpu.memory_space<vmem>>, vector<8x256xf32>,
    %c0_27 = arith.constant 0 : index
    %c0_28 = arith.constant 0 : index
    %58 = vector.load %arg4[%c0_27, %c0_28] : memref<64x72xf32, #tpu.memory_space<vmem>>, vector<64x72xf32>
    %c0_29 = arith.constant 0 : index
    %c0_30 = arith.constant 0 : index
    %59 = vector.load %arg14[%c0_29, %c0_30] : memref<288x256xf32, #tpu.memory_space<vmem>>, vector<72x256xf32>
    %cst_31 = arith.constant dense<0.000000e+00> : vector<64x256xf32>
    %60 = tpu.matmul %58, %59, %cst_31 {dimension_numbers = #tpu.dot_dimension_numbers<[1], [0], [0], [1], [0, 0, 1, 1], [], []>} : vector<64x72xf32>, vector<72x256xf32>, vector<64x256xf32> -> vector<64x256xf32>
    %c0_32 = arith.constant 0 : index
    %c0_33 = arith.constant 0 : index
    %61 = vector.load %arg5[%c0_32, %c0_33] : memref<64x1xf32, #tpu.memory_space<vmem>>, vector<64x1xf32>
    %62 = vector.broadcast %61 : vector<64x1xf32> to vector<64x256xf32>
    %63 = arith.addf %60, %62 : vector<64x256xf32>
    %64 = vector.extract_strided_slice %63 {offsets = [0, 0], sizes = [32, 256], strides = [1, 1]} : vector<64x256xf32> to vector<32x256xf32>
    %cst_34 = arith.constant 0.000000e+00 : f32
    %65 = vector.broadcast %cst_34 : f32 to vector<32x256xf32>
    %66 = arith.maximumf %64, %65 : vector<32x256xf32>
    %67 = vector.extract_strided_slice %63 {offsets = [32, 0], sizes = [32, 256], strides = [1, 1]} : vector<64x256xf32> to vector<32x256xf32>
    %cst_35 = arith.constant 0.707106769 : f32
    %68 = vector.broadcast %cst_35 : f32 to vector<32x256xf32>
    %69 = arith.mulf %67, %68 : vector<32x256xf32>
    %70 = math.absf %69 : vector<32x256xf32>
    %cst_36 = arith.constant 0.327591091 : f32
    %71 = vector.broadcast %cst_36 : f32 to vector<32x256xf32>
    %72 = arith.mulf %71, %70 : vector<32x256xf32>
    %cst_37 = arith.constant 1.000000e+00 : f32
    %73 = vector.broadcast %cst_37 : f32 to vector<32x256xf32>
    %74 = arith.addf %73, %72 : vector<32x256xf32>
    %cst_38 = arith.constant 1.000000e+00 : f32
    %75 = vector.broadcast %cst_38 : f32 to vector<32x256xf32>
    %76 = arith.divf %75, %74 : vector<32x256xf32>
    %cst_39 = arith.constant 1.06140542 : f32
    %77 = vector.broadcast %cst_39 : f32 to vector<32x256xf32>
    %78 = arith.mulf %77, %76 : vector<32x256xf32>
    %cst_40 = arith.constant 1.45315206 : f32
    %79 = vector.broadcast %cst_40 : f32 to vector<32x256xf32>
    %80 = arith.subf %78, %79 : vector<32x256xf32>
    %81 = arith.mulf %80, %76 : vector<32x256xf32>
    %cst_41 = arith.constant 1.42141378 : f32
    %82 = vector.broadcast %cst_41 : f32 to vector<32x256xf32>
    %83 = arith.addf %81, %82 : vector<32x256xf32>
    %84 = arith.mulf %83, %76 : vector<32x256xf32>
    %cst_42 = arith.constant 0.284496725 : f32
    %85 = vector.broadcast %cst_42 : f32 to vector<32x256xf32>
    %86 = arith.subf %84, %85 : vector<32x256xf32>
    %87 = arith.mulf %86, %76 : vector<32x256xf32>
    %cst_43 = arith.constant 0.254829586 : f32
    %88 = vector.broadcast %cst_43 : f32 to vector<32x256xf32>
    %89 = arith.addf %87, %88 : vector<32x256xf32>
    %90 = arith.mulf %89, %76 : vector<32x256xf32>
    %cst_44 = arith.constant 0.000000e+00 : f32
    %91 = vector.broadcast %cst_44 : f32 to vector<32x256xf32>
    %92 = arith.subf %91, %70 : vector<32x256xf32>
    %93 = arith.mulf %92, %70 : vector<32x256xf32>
    %94 = math.exp %93 : vector<32x256xf32>
    %95 = arith.mulf %90, %94 : vector<32x256xf32>
    %cst_45 = arith.constant 1.000000e+00 : f32
    %96 = vector.broadcast %cst_45 : f32 to vector<32x256xf32>
    %97 = arith.subf %96, %95 : vector<32x256xf32>
    %cst_46 = arith.constant 0.000000e+00 : f32
    %98 = vector.broadcast %cst_46 : f32 to vector<32x256xf32>
    %99 = arith.cmpf oge, %69, %98 : vector<32x256xf32>
    %cst_47 = arith.constant 0.000000e+00 : f32
    %100 = vector.broadcast %cst_47 : f32 to vector<32x256xf32>
    %101 = arith.subf %100, %97 : vector<32x256xf32>
    %102 = arith.select %99, %97, %101 : vector<32x256xi1>, vector<32x256xf32>
    %cst_48 = arith.constant 5.000000e-01 : f32
    %103 = vector.broadcast %cst_48 : f32 to vector<32x256xf32>
    %104 = arith.mulf %103, %67 : vector<32x256xf32>
    %cst_49 = arith.constant 1.000000e+00 : f32
    %105 = vector.broadcast %cst_49 : f32 to vector<32x256xf32>
    %106 = arith.addf %105, %102 : vector<32x256xf32>
    %107 = arith.mulf %104, %106 : vector<32x256xf32>
    %c0_50 = arith.constant 0 : index
    %c0_51 = arith.constant 0 : index
    %108 = vector.load %arg6[%c0_50, %c0_51] : memref<8x32xf32, #tpu.memory_space<vmem>>, vector<8x32xf32>
    %cst_52 = arith.constant dense<0.000000e+00> : vector<8x256xf32>
    %109 = tpu.matmul %108, %66, %cst_52 {dimension_numbers = #tpu.dot_dimension_numbers<[1], [0], [0], [1], [0, 0, 1, 1], [], []>} : vector<8x32xf32>, vector<32x256xf32>, vector<8x256xf32> -> vector<8x256xf32>
    %110 = vector.extract_strided_slice %109 {offsets = [0, 0], sizes = [1, 256], strides = [1, 1]} : vector<8x256xf32> to vector<1x256xf32>
    %c0_53 = arith.constant 0 : index
    %c0_54 = arith.constant 0 : index
    %111 = vector.load %arg7[%c0_53, %c0_54] : memref<1x1xf32, #tpu.memory_space<vmem>>, vector<1x1xf32>
    %112 = vector.broadcast %111 : vector<1x1xf32> to vector<1x256xf32>
    %113 = arith.addf %110, %112 : vector<1x256xf32>
    %cst_55 = arith.constant 0.000000e+00 : f32
    %114 = vector.broadcast %cst_55 : f32 to vector<1x256xf32>
    %115 = arith.subf %114, %113 : vector<1x256xf32>
    %116 = math.exp %115 : vector<1x256xf32>
    %cst_56 = arith.constant 1.000000e+00 : f32
    %117 = vector.broadcast %cst_56 : f32 to vector<1x256xf32>
    %118 = arith.addf %117, %116 : vector<1x256xf32>
    %cst_57 = arith.constant 1.000000e+00 : f32
    %119 = vector.broadcast %cst_57 : f32 to vector<1x256xf32>
    %120 = arith.divf %119, %118 : vector<1x256xf32>
    %c17_i32_58 = arith.constant 17 : i32
    %121 = tpu.dynamic_rotate %107 by %c17_i32_58 dim 1 : vector<32x256xf32>, i32 -> vector<32x256xf32>
    %122 = vector.extract_strided_slice %4 {offsets = [0, 0], sizes = [1, 256], strides = [1, 1]} : vector<9x256xf32> to vector<1x256xf32>
    %123 = vector.broadcast %122 : vector<1x256xf32> to vector<32x256xf32>
    %124 = arith.mulf %121, %123 : vector<32x256xf32>
    %c0_59 = arith.constant 0 : index
    %c0_60 = arith.constant 0 : index
    %125 = vector.load %arg14[%c0_59, %c0_60] : memref<288x256xf32, #tpu.memory_space<vmem>>, vector<32x256xf32>
    tpu.vector_store %arg14[%c0_59, %c0_60], %124 {strides = array<i32>} : memref<288x256xf32, #tpu.memory_space<vmem>>, vector<32x256xf32>,
    %c16_i32_61 = arith.constant 16 : i32
    %126 = tpu.dynamic_rotate %107 by %c16_i32_61 dim 1 : vector<32x256xf32>, i32 -> vector<32x256xf32>
    %127 = vector.extract_strided_slice %4 {offsets = [1, 0], sizes = [1, 256], strides = [1, 1]} : vector<9x256xf32> to vector<1x256xf32>
    %128 = vector.broadcast %127 : vector<1x256xf32> to vector<32x256xf32>
    %129 = arith.mulf %126, %128 : vector<32x256xf32>
    %c32_62 = arith.constant 32 : index
    %c0_63 = arith.constant 0 : index
    %130 = vector.load %arg14[%c32_62, %c0_63] : memref<288x256xf32, #tpu.memory_space<vmem>>, vector<32x256xf32>
    tpu.vector_store %arg14[%c32_62, %c0_63], %129 {strides = array<i32>} : memref<288x256xf32, #tpu.memory_space<vmem>>, vector<32x256xf32>,
    %c15_i32_64 = arith.constant 15 : i32
    %131 = tpu.dynamic_rotate %107 by %c15_i32_64 dim 1 : vector<32x256xf32>, i32 -> vector<32x256xf32>
    %132 = vector.extract_strided_slice %4 {offsets = [2, 0], sizes = [1, 256], strides = [1, 1]} : vector<9x256xf32> to vector<1x256xf32>
    %133 = vector.broadcast %132 : vector<1x256xf32> to vector<32x256xf32>
    %134 = arith.mulf %131, %133 : vector<32x256xf32>
    %c64_65 = arith.constant 64 : index
    %c0_66 = arith.constant 0 : index
    %135 = vector.load %arg14[%c64_65, %c0_66] : memref<288x256xf32, #tpu.memory_space<vmem>>, vector<32x256xf32>
    tpu.vector_store %arg14[%c64_65, %c0_66], %134 {strides = array<i32>} : memref<288x256xf32, #tpu.memory_space<vmem>>, vector<32x256xf32>,
    %c1_i32_67 = arith.constant 1 : i32
    %136 = tpu.dynamic_rotate %107 by %c1_i32_67 dim 1 : vector<32x256xf32>, i32 -> vector<32x256xf32>
    %137 = vector.extract_strided_slice %4 {offsets = [3, 0], sizes = [1, 256], strides = [1, 1]} : vector<9x256xf32> to vector<1x256xf32>
    %138 = vector.broadcast %137 : vector<1x256xf32> to vector<32x256xf32>
    %139 = arith.mulf %136, %138 : vector<32x256xf32>
    %c96 = arith.constant 96 : index
    %c0_68 = arith.constant 0 : index
    %140 = vector.load %arg14[%c96, %c0_68] : memref<288x256xf32, #tpu.memory_space<vmem>>, vector<32x256xf32>
    tpu.vector_store %arg14[%c96, %c0_68], %139 {strides = array<i32>} : memref<288x256xf32, #tpu.memory_space<vmem>>, vector<32x256xf32>,
    %c128 = arith.constant 128 : index
    %c0_69 = arith.constant 0 : index
    %141 = vector.load %arg14[%c128, %c0_69] : memref<288x256xf32, #tpu.memory_space<vmem>>, vector<32x256xf32>
    tpu.vector_store %arg14[%c128, %c0_69], %107 {strides = array<i32>} : memref<288x256xf32, #tpu.memory_space<vmem>>, vector<32x256xf32>,
    %c255_i32_70 = arith.constant 255 : i32
    %142 = tpu.dynamic_rotate %107 by %c255_i32_70 dim 1 : vector<32x256xf32>, i32 -> vector<32x256xf32>
    %143 = vector.extract_strided_slice %4 {offsets = [5, 0], sizes = [1, 256], strides = [1, 1]} : vector<9x256xf32> to vector<1x256xf32>
    %144 = vector.broadcast %143 : vector<1x256xf32> to vector<32x256xf32>
    %145 = arith.mulf %142, %144 : vector<32x256xf32>
    %c160 = arith.constant 160 : index
    %c0_71 = arith.constant 0 : index
    %146 = vector.load %arg14[%c160, %c0_71] : memref<288x256xf32, #tpu.memory_space<vmem>>, vector<32x256xf32>
    tpu.vector_store %arg14[%c160, %c0_71], %145 {strides = array<i32>} : memref<288x256xf32, #tpu.memory_space<vmem>>, vector<32x256xf32>,
    %c241_i32_72 = arith.constant 241 : i32
    %147 = tpu.dynamic_rotate %107 by %c241_i32_72 dim 1 : vector<32x256xf32>, i32 -> vector<32x256xf32>
    %148 = vector.extract_strided_slice %4 {offsets = [6, 0], sizes = [1, 256], strides = [1, 1]} : vector<9x256xf32> to vector<1x256xf32>
    %149 = vector.broadcast %148 : vector<1x256xf32> to vector<32x256xf32>
    %150 = arith.mulf %147, %149 : vector<32x256xf32>
    %c192 = arith.constant 192 : index
    %c0_73 = arith.constant 0 : index
    %151 = vector.load %arg14[%c192, %c0_73] : memref<288x256xf32, #tpu.memory_space<vmem>>, vector<32x256xf32>
    tpu.vector_store %arg14[%c192, %c0_73], %150 {strides = array<i32>} : memref<288x256xf32, #tpu.memory_space<vmem>>, vector<32x256xf32>,
    %c240_i32_74 = arith.constant 240 : i32
    %152 = tpu.dynamic_rotate %107 by %c240_i32_74 dim 1 : vector<32x256xf32>, i32 -> vector<32x256xf32>
    %153 = vector.extract_strided_slice %4 {offsets = [7, 0], sizes = [1, 256], strides = [1, 1]} : vector<9x256xf32> to vector<1x256xf32>
    %154 = vector.broadcast %153 : vector<1x256xf32> to vector<32x256xf32>
    %155 = arith.mulf %152, %154 : vector<32x256xf32>
    %c224 = arith.constant 224 : index
    %c0_75 = arith.constant 0 : index
    %156 = vector.load %arg14[%c224, %c0_75] : memref<288x256xf32, #tpu.memory_space<vmem>>, vector<32x256xf32>
    tpu.vector_store %arg14[%c224, %c0_75], %155 {strides = array<i32>} : memref<288x256xf32, #tpu.memory_space<vmem>>, vector<32x256xf32>,
    %c239_i32_76 = arith.constant 239 : i32
    %157 = tpu.dynamic_rotate %107 by %c239_i32_76 dim 1 : vector<32x256xf32>, i32 -> vector<32x256xf32>
    %158 = vector.extract_strided_slice %4 {offsets = [8, 0], sizes = [1, 256], strides = [1, 1]} : vector<9x256xf32> to vector<1x256xf32>
    %159 = vector.broadcast %158 : vector<1x256xf32> to vector<32x256xf32>
    %160 = arith.mulf %157, %159 : vector<32x256xf32>
    %c256 = arith.constant 256 : index
    %c0_77 = arith.constant 0 : index
    %161 = vector.load %arg14[%c256, %c0_77] : memref<288x256xf32, #tpu.memory_space<vmem>>, vector<32x256xf32>
    tpu.vector_store %arg14[%c256, %c0_77], %160 {strides = array<i32>} : memref<288x256xf32, #tpu.memory_space<vmem>>, vector<32x256xf32>,
    %c0_78 = arith.constant 0 : index
    %c0_79 = arith.constant 0 : index
    %162 = vector.load %arg8[%c0_78, %c0_79] : memref<64x288xf32, #tpu.memory_space<vmem>>, vector<64x288xf32>
    %c0_80 = arith.constant 0 : index
    %c0_81 = arith.constant 0 : index
    %163 = vector.load %arg14[%c0_80, %c0_81] : memref<288x256xf32, #tpu.memory_space<vmem>>, vector<288x256xf32>
    %cst_82 = arith.constant dense<0.000000e+00> : vector<64x256xf32>
    %164 = tpu.matmul %162, %163, %cst_82 {dimension_numbers = #tpu.dot_dimension_numbers<[1], [0], [0], [1], [0, 0, 1, 1], [], []>} : vector<64x288xf32>, vector<288x256xf32>, vector<64x256xf32> -> vector<64x256xf32>
    %c0_83 = arith.constant 0 : index
    %c0_84 = arith.constant 0 : index
    %165 = vector.load %arg9[%c0_83, %c0_84] : memref<64x1xf32, #tpu.memory_space<vmem>>, vector<64x1xf32>
    %166 = vector.broadcast %165 : vector<64x1xf32> to vector<64x256xf32>
    %167 = arith.addf %164, %166 : vector<64x256xf32>
    %168 = vector.broadcast %120 : vector<1x256xf32> to vector<64x256xf32>
    %169 = arith.mulf %167, %168 : vector<64x256xf32>
    %c0_85 = arith.constant 0 : index
    %c0_86 = arith.constant 0 : index
    %170 = vector.load %arg10[%c0_85, %c0_86] : memref<64x64xf32, #tpu.memory_space<vmem>>, vector<64x64xf32>
    %cst_87 = arith.constant dense<0.000000e+00> : vector<64x256xf32>
    %171 = tpu.matmul %170, %169, %cst_87 {dimension_numbers = #tpu.dot_dimension_numbers<[1], [0], [0], [1], [0, 0, 1, 1], [], []>} : vector<64x64xf32>, vector<64x256xf32>, vector<64x256xf32> -> vector<64x256xf32>
    %c0_88 = arith.constant 0 : index
    %c0_89 = arith.constant 0 : index
    %172 = vector.load %arg11[%c0_88, %c0_89] : memref<64x1xf32, #tpu.memory_space<vmem>>, vector<64x1xf32>
    %173 = vector.broadcast %172 : vector<64x1xf32> to vector<64x256xf32>
    %174 = arith.addf %171, %173 : vector<64x256xf32>
    %c0_90 = arith.constant 0 : index
    %c0_91 = arith.constant 0 : index
    %c0_92 = arith.constant 0 : index
    %175 = vector.load %arg12[%c0_90, %c0_91, %c0_92] : memref<1x64x256xf32, #tpu.memory_space<vmem>>, vector<1x64x256xf32>
    %176 = vector.shape_cast %175 : vector<1x64x256xf32> to vector<64x256xf32>
    %177 = vector.shape_cast %174 : vector<64x256xf32> to vector<1x64x256xf32>
    tpu.vector_store %arg12[%c0_90, %c0_91, %c0_92], %177 {strides = array<i32>} : memref<1x64x256xf32, #tpu.memory_space<vmem>>, vector<1x64x256xf32>,
    return
  }
  func.func @transform_0(%arg0: i32) -> (i32, i32, i32) {
    %c0_i32 = arith.constant 0 : i32
    %c0_i32_0 = arith.constant 0 : i32
    %c0_i32_1 = arith.constant 0 : i32
    return %arg0, %c0_i32, %c0_i32_0 : i32, i32, i32
  }
  func.func @transform_1(%arg0: i32) -> (i32, i32, i32) {
    %c0_i32 = arith.constant 0 : i32
    %c0_i32_0 = arith.constant 0 : i32
    %c0_i32_1 = arith.constant 0 : i32
    return %arg0, %c0_i32, %c0_i32_0 : i32, i32, i32
  }
  func.func @transform_2(%arg0: i32) -> (i32, i32) {
    %c0_i32 = arith.constant 0 : i32
    %c0_i32_0 = arith.constant 0 : i32
    %c0_i32_1 = arith.constant 0 : i32
    return %c0_i32, %c0_i32_0 : i32, i32
  }
  func.func @transform_3(%arg0: i32) -> (i32, i32) {
    %c0_i32 = arith.constant 0 : i32
    %c0_i32_0 = arith.constant 0 : i32
    %c0_i32_1 = arith.constant 0 : i32
    return %c0_i32, %c0_i32_0 : i32, i32
  }
  func.func @transform_4(%arg0: i32) -> (i32, i32) {
    %c0_i32 = arith.constant 0 : i32
    %c0_i32_0 = arith.constant 0 : i32
    %c0_i32_1 = arith.constant 0 : i32
    return %c0_i32, %c0_i32_0 : i32, i32
  }
  func.func @transform_5(%arg0: i32) -> (i32, i32) {
    %c0_i32 = arith.constant 0 : i32
    %c0_i32_0 = arith.constant 0 : i32
    %c0_i32_1 = arith.constant 0 : i32
    return %c0_i32, %c0_i32_0 : i32, i32
  }
  func.func @transform_6(%arg0: i32) -> (i32, i32) {
    %c0_i32 = arith.constant 0 : i32
    %c0_i32_0 = arith.constant 0 : i32
    %c0_i32_1 = arith.constant 0 : i32
    return %c0_i32, %c0_i32_0 : i32, i32
  }
  func.func @transform_7(%arg0: i32) -> (i32, i32) {
    %c0_i32 = arith.constant 0 : i32
    %c0_i32_0 = arith.constant 0 : i32
    %c0_i32_1 = arith.constant 0 : i32
    return %c0_i32, %c0_i32_0 : i32, i32
  }
  func.func @transform_8(%arg0: i32) -> (i32, i32) {
    %c0_i32 = arith.constant 0 : i32
    %c0_i32_0 = arith.constant 0 : i32
    %c0_i32_1 = arith.constant 0 : i32
    return %c0_i32, %c0_i32_0 : i32, i32
  }
  func.func @transform_9(%arg0: i32) -> (i32, i32) {
    %c0_i32 = arith.constant 0 : i32
    %c0_i32_0 = arith.constant 0 : i32
    %c0_i32_1 = arith.constant 0 : i32
    return %c0_i32, %c0_i32_0 : i32, i32
  }
  func.func @transform_10(%arg0: i32) -> (i32, i32) {
    %c0_i32 = arith.constant 0 : i32
    %c0_i32_0 = arith.constant 0 : i32
    %c0_i32_1 = arith.constant 0 : i32
    return %c0_i32, %c0_i32_0 : i32, i32
  }
  func.func @transform_11(%arg0: i32) -> (i32, i32, i32) {
    %c0_i32 = arith.constant 0 : i32
    %c0_i32_0 = arith.constant 0 : i32
    %c0_i32_1 = arith.constant 0 : i32
    return %arg0, %c0_i32, %c0_i32_0 : i32, i32, i32
  }
}

</mosaic_0001>

<bundles_post_ra>
// kernel: tpu_custom_call.1
= control target key start
LH: loop header
LB: loop body
LE: loop exit
PB: predicated region body
PF: predicated region fallthrough
CT: control target
= control target key end

     0   :  { %s4275_s0 = inlined_call_operand.hbm [shape: f32[2,64,256], index: 0, kind: input, shape index: {}]   ;;  %s4276_s1 = inlined_call_operand.vmem [shape: f32[2,1,256], index: 1, kind: input, shape index: {}]   ;;  %s4277_s2 = inlined_call_operand.hbm [shape: f32[9,256], index: 2, kind: input, shape index: {}]   ;;  %s4278_s3 = inlined_call_operand.hbm [shape: f32[64,72], index: 3, kind: input, shape index: {}]   ;;  %s4279_s4 = inlined_call_operand.vmem [shape: f32[64,1], index: 4, kind: input, shape index: {}]   ;;  %s4280_s5 = inlined_call_operand.vmem [shape: f32[8,32], index: 5, kind: input, shape index: {}]   ;;  %s4281_s6 = inlined_call_operand.<no memory space> [shape: f32[1,1], index: 6, kind: input, shape index: {}]   ;;  %s4282_s7 = inlined_call_operand.vmem [shape: f32[64,288], index: 7, kind: input, shape index: {}]   ;;  %s4283_s8 = inlined_call_operand.vmem [shape: f32[64,1], index: 8, kind: input, shape index: {}]   ;;  %s4284_s9 = inlined_call_operand.hbm [shape: f32[64,64], index: 9, kind: input, shape index: {}]   ;;  %s4285_s10 = inlined_call_operand.vmem [shape: f32[64,1], index: 10, kind: input, shape index: {}]   ;;  %s4286_s11 = inlined_call_operand.hbm [shape: f32[2,64,256], index: 11, kind: output, shape index: {}]  }
   0x1   :  { %4309 = sst [smem:[#allocation23_spill]] %s4277_s2  ;;  %v16_v0 = vstv %s4281_s6 }
   0x2   :  { %4310 = sst [smem:[#allocation24_spill]] %s4285_s10  ;;  %17 = vst [vmem:[#allocation4] sm:$0x1] %v16_v0 }
   0x3   :  { %4311 = sst [smem:[#allocation25_spill]] %s4286_s11 }
   0x4   :  { %18 = vsyncpa [#allocation6], 0 }
   0x5   :  { %20 = vsyncpa [#allocation6 + $0x1], 0 }
   0x6   :  { %21 = vsyncpa [#allocation9], 0 }
   0x7   :  { %22 = vsyncpa [#allocation12], 0 }
   0x8   :  { %23 = vsyncpa [#allocation7], 0 }
   0x9   :  { %25 = vsyncpa [#allocation7 + $0x1], 0  ;;  %s2997_s19 = smov 0   ;;  %s2999_s20 = smov 0  }
   0xa   :  { %s3001_s21 = smov 0   ;;  %s3003_s22 = smov 0  }
   0xb LB: > { %4312 = sst [smem:[#allocation18_spill]] %s2899_s19  ;;  %s3018_s6 = sadd.s32 4294967295, %s2911_s22   ;;  %s2911_s22 = sphi %s3003_s22, %s4356_s22   ;;  %s2907_s21 = sphi %s3001_s21, %s4355_s21   ;;  %s2903_s20 = sphi %s2999_s20, %s4354_s20   ;;  %s2899_s19 = sphi %s2997_s19, %s4353_s19  }
   0xc   : > { %s2372_s23 = sadd.s32 4294967294, %s2911_s22   ;;  %p51_p0 = scmp.ne.s32.totalorder %s2903_s20, %s2899_s19 }
   0xd   : > { %p4287_p1 = scmp.eq.s32.totalorder %s3018_s6, 0  ;;  %p296_p3 = scmp.eq.s32.totalorder %s2372_s23, 1 }
   0xe   : > { %p2373_p5 = scmp.ge.s32.totalorder %s2911_s22, 1  ;;  %p303_p7 = scmp.lt.s32.totalorder %s2911_s22, 3 }
   0xf   : > { %p3027_p4 = por %p4287_p1, %p51_p0  ;;  %p3032_p6 = por %p296_p3, %p51_p0 }
  0x10   : > { %p3037_p8 = pnand %p2373_p5, %p303_p7  ;;  %s2913_s27 = smov [#allocation8]  }
  0x11   : > { %s4313_s24 = scalar_select %p3027_p4, 1, 0 }
  0x12   : > { %s4314_s25 = scalar_select %p3032_p6, 1, 0 }
  0x13   : > { %s4316_s26 = scalar_select %p3037_p8, 1, 0 }
  0x14   : > { %4315 = sst [smem:[#allocation19_spill]] %s4314_s25  ;;  %s315_s28 = sshll.u32 %s2913_s27, 4  ;;  %s3041_s28 = int_to_ptr.vmem [resolvable:$true] %s315_s28 }
  0x15   : > { %p2602_p9 = pneg %p3037_p8  ;;  %s2914_s30 = smov [#allocation10]  }
  0x16   : > { %s328_s12 = sshll.u32 %s2914_s30, 4  ;;  %s4318_s2 = sld [smem:[#allocation23_spill]]  ;;  %s3052_s12 = int_to_ptr.vmem [resolvable:$true] %s328_s12 }
  0x17   : > { %p3048_p11 = pnand %p2602_p9, %p4287_p1 }
  0x19   : > { %p3062_p13 = pneg %p3048_p11 }
  0x1c   : > { %s2723_s15 = scalar_lea.hbm %s4318_s2, 512 }
  0x1d   : > { %p2724_p12 = scmp.ne.s32.totalorder %s4318_s2, %s2723_s15  ;;  %p2730_p5 = scmp.lt.u32.totalorder %s2723_s15, %s4318_s2 }
  0x1f   : > { %p2726_p0 = pnand %p3062_p13, %p2724_p12 }
  0x21   : > { %p2727_p3 = pneg %p2726_p0 }
  0x23   : > { %p2732_p7 = pnand %p2730_p5, %p2727_p3 }
  0x25   : > { %2735 = shalt.err (!%p2732_p7)
}
  0x26   : > { %s2736_s30 = scalar_lea.vmem %s3041_s28, 512  ;;  %p2744_p2 = scmp.lt.s32.totalorder %s3041_s28, %s3041_s28 }
  0x27   : > { %p2737_p9 = scmp.ne.s32.totalorder %s3041_s28, %s2736_s30  ;;  %p2745_p6 = scmp.lt.s32.totalorder %s2736_s30, %s2736_s30 }
  0x29   : > { %p2739_p10 = pnand %p2737_p9, %p3062_p13  ;;  %p2746_p12 = por %p2745_p6, %p2744_p2 }
  0x2b   : > { %p2740_p1 = pneg %p2739_p10 }
  0x2d   : > { %p2747_p0 = pnand %p2746_p12, %p2740_p1 }
  0x2f   : > { %2750 = shalt.err (!%p2747_p0)
}
  0x30   : > { %s4291_s13 = smov 256   ;;  %s4292_s14 = smov 16  }
  0x31   : > { %2605 = dma.hbm_to_vmem [thread:$0]  (!%p3048_p11), %s4318_s2, 512, %s3041_s28, [#allocation9], %s4291_s13, %s4291_s13, %s4292_s14  }
  0x32   : > { %s2751_s27 = scalar_lea.hbm %s4278_s3, 1024 }
  0x33   : > { %p2752_p1 = scmp.ne.s32.totalorder %s4278_s3, %s2751_s27  ;;  %p2758_p10 = scmp.lt.u32.totalorder %s2751_s27, %s4278_s3 }
  0x35   : > { %p2754_p2 = pnand %p2752_p1, %p3062_p13 }
  0x37   : > { %p2755_p6 = pneg %p2754_p2 }
  0x39   : > { %p2760_p3 = pnand %p2758_p10, %p2755_p6 }
  0x3b   : > { %2763 = shalt.err (!%p2760_p3)
}
  0x3c   : > { %s2764_s28 = scalar_lea.vmem %s3052_s12, 1024  ;;  %p2772_p12 = scmp.lt.s32.totalorder %s3052_s12, %s3052_s12 }
  0x3d   : > { %p2765_p5 = scmp.ne.s32.totalorder %s3052_s12, %s2764_s28  ;;  %p2773_p0 = scmp.lt.s32.totalorder %s2764_s28, %s2764_s28 }
  0x3f   : > { %p2767_p7 = pnand %p2765_p5, %p3062_p13  ;;  %p2774_p1 = por %p2773_p0, %p2772_p12 }
  0x41   : > { %p2768_p9 = pneg %p2767_p7 }
  0x43   : > { %p2775_p2 = pnand %p2774_p1, %p2768_p9 }
  0x45   : > { %2778 = shalt.err (!%p2775_p2)
}
  0x46   : > { %s2917_s25 = smov 128   ;;  %s2918_s11 = smov 8  }
  0x47   : > { %2608 = dma.hbm_to_vmem [thread:$0]  (!%p3048_p11), %s4278_s3, 1024, %s3052_s12, [#allocation9], %s2917_s25, %s2917_s25, %s2918_s11  }
  0x48   : > { %s2919_s16 = smov [#allocation11]   ;;  %s3110_s23 = sadd.s32 1, %s2911_s22  }
  0x49   : > { %s356_s17 = sshll.u32 %s2919_s16, 4  ;;  %s2779_s28 = scalar_lea.hbm %s4284_s9, 1024  ;;  %s357_s17 = int_to_ptr.vmem [resolvable:$true] %s356_s17 }
  0x4a   : > { %p2780_p6 = scmp.ne.s32.totalorder %s4284_s9, %s2779_s28  ;;  %p2786_p5 = scmp.lt.u32.totalorder %s2779_s28, %s4284_s9 }
  0x4c   : > { %p2782_p10 = pnand %p2780_p6, %p3062_p13 }
  0x4e   : > { %p2783_p3 = pneg %p2782_p10 }
  0x50   : > { %p2788_p7 = pnand %p2786_p5, %p2783_p3 }
  0x52   : > { %2791 = shalt.err (!%p2788_p7)
}
  0x53   : > { %s2792_s12 = scalar_lea.vmem %s357_s17, 1024  ;;  %p2800_p1 = scmp.lt.s32.totalorder %s357_s17, %s357_s17 }
  0x54   : > { %p2793_p9 = scmp.ne.s32.totalorder %s357_s17, %s2792_s12  ;;  %p2801_p2 = scmp.lt.s32.totalorder %s2792_s12, %s2792_s12 }
  0x56   : > { %p2795_p12 = pnand %p2793_p9, %p3062_p13  ;;  %p2802_p4 = por %p2801_p2, %p2800_p1 }
  0x58   : > { %p2796_p0 = pneg %p2795_p12 }
  0x5a   : > { %p2803_p8 = pnand %p2802_p4, %p2796_p0 }
  0x5c   : > { %2806 = shalt.err (!%p2803_p8)
}
  0x5d   : > { %2611 = dma.hbm_to_vmem [thread:$0]  (!%p3048_p11), %s4284_s9, 1024, %s357_s17, [#allocation12], %s2917_s25, %s2917_s25, %s2918_s11  }
  0x5e   : > { %s35_s2 = ssub.s32 %s2911_s22, %s3110_s23  ;;  %s38_s10 = sadd.s32 1, %s2907_s21 }
  0x5f   : > { %p36_p4 = scmp.eq.s32.totalorder %s35_s2, 0  ;;  %p45_p8 = scmp.ne.s32.totalorder %s2907_s21, %s2903_s20 }
  0x60   : > { %p46_p13 = scmp.eq.s32.totalorder %s2911_s22, 0  ;;  %p2623_p6 = scmp.lt.s32.totalorder %s2911_s22, 2 }
  0x61   : > { %s3138_s29 = scalar_select %p36_p4, %s2907_s21, %s38_s10  }
  0x62   : > { %p47_p10 = por %p46_p13, %p45_p8  ;;  %p4320_p3 = scmp.eq.s32.totalorder %s3018_s6, 1 }
  0x63   : > { %s373_s19 = sand.u32 1, %s2907_s21   ;;  %s2436_s15 = sshll.u32 %s2911_s22, 11 }
  0x64   : > { %p3142_p5 = por %p4320_p3, %p45_p8  ;;  %s2378_s16 = sshll.u32 %s373_s19, 7 }
  0x65   : > { %s3151_s25 = scalar_lea.hbm %s4275_s0, %s2436_s15  ;;  %s377_s11 = scalar_lea.vmem [#allocation5], %s2378_s16 }
  0x66   : > { %s384_s17 = sshll.u32 %s377_s11, 4  ;;  %p3153_p11 = pnand %p2623_p6, %p47_p10  ;;  %s3157_s17 = int_to_ptr.vmem [resolvable:$true] %s384_s17 }
  0x67   : > { %s3159_s12 = scalar_lea.sflag [#allocation6], %s373_s19  ;;  %s2807_s13 = scalar_lea.hbm %s3151_s25, 2048 }
  0x68   : > { %p2808_p7 = scmp.ne.s32.totalorder %s3151_s25, %s2807_s13  ;;  %p2809_p9 = pneg %p3153_p11 }
  0x69   : > { %s2812_s10 = scalar_lea.hbm %s4275_s0, 4096  ;;  %p2813_p1 = scmp.lt.u32.totalorder %s3151_s25, %s4275_s0 }
  0x6a   : > { %p2810_p12 = pnand %p2809_p9, %p2808_p7  ;;  %p2814_p2 = scmp.lt.u32.totalorder %s2812_s10, %s2807_s13 }
  0x6b   : > { %p2816_p8 = scmp.lt.u32.totalorder %s2807_s13, %s3151_s25 }
  0x6c   : > { %p2811_p0 = pneg %p2810_p12  ;;  %p2815_p4 = por %p2814_p2, %p2813_p1 }
  0x6e   : > { %p2817_p13 = por %p2816_p8, %p2815_p4 }
  0x70   : > { %p2818_p6 = pnand %p2817_p13, %p2811_p0 }
  0x72   : > { %2821 = shalt.err (!%p2818_p6)
}
  0x73   : > { %s2822_s19 = scalar_lea.vmem %s3157_s17, 2048  ;;  %s2920_s27 = smov [#allocation5]  }
  0x74   : > { %p2823_p10 = scmp.ne.s32.totalorder %s3157_s17, %s2822_s19  ;;  %s2827_s30 = sshll.u32 %s2920_s27, 4  ;;  %s2828_s30 = int_to_ptr.vmem [resolvable:$false] %s2827_s30 }
  0x75   : > { %s2829_s11 = scalar_lea.vmem %s2828_s30, 4096  ;;  %p2830_p12 = scmp.lt.s32.totalorder %s3157_s17, %s2828_s30 }
  0x76   : > { %p2825_p3 = pnand %p2823_p10, %p2809_p9  ;;  %p2831_p1 = scmp.lt.s32.totalorder %s2829_s11, %s2822_s19 }
  0x78   : > { %p2826_p7 = pneg %p2825_p3  ;;  %p2832_p2 = por %p2831_p1, %p2830_p12 }
  0x7a   : > { %p2833_p4 = pnand %p2832_p2, %p2826_p7 }
  0x7c   : > { %2836 = shalt.err (!%p2833_p4)
}
  0x7d   : > { %s4323_s13 = smov 16   ;;  %s4324_s14 = smov 256  }
  0x7e   : > { %2615 = dma.hbm_to_vmem [thread:$0]  (!%p3153_p11), %s3151_s25, 2048, %s3157_s17, %s3159_s12, %s4324_s14, %s4324_s14, %s4323_s13  }
  0x7f   : > { %p4325_p9 = scmp.ne.s32.totalorder %s4316_s26, 0 }
  0x81   : > { %403 = sbr.rel (%p4325_p9) target bundleno = 1376 (0x560), region = 64 }
  0x88   : > { %s3193_s2 = sand.u32 1, %s2903_s20   ;;  %p4326_p0 = scmp.ne.s32.totalorder %s4313_s24, 0 }
  0x89   : > { %s4296_s10 = sshll.u32 %s3193_s2, 7  ;;  %s406_s15 = scalar_lea.sflag [#allocation6], %s3193_s2 }
  0x8a   : > { %s3199_s28 = scalar_lea.vmem [#allocation5], %s4296_s10 }
  0x8b   : > { %2882 = dma.done.wait (%p4326_p0), %s406_s15, 2048  }
  0x8c   : > { %2884 = vsyncadd (%p4326_p0), %s406_s15, 4294965248  ;;  %p4327_p11 = scmp.eq.s32.totalorder %s3018_s6, 0 }
  0x8e   : > { %2886 = dma.done.wait (%p4327_p11), [#allocation9], 1536   ;;  %p4328_p8 = pmov %p4327_p11 }
  0x90   : > { %2888 = vsyncadd (%p4328_p8), [#allocation9], 4294965760  ;;  %p4329_p13 = pmov %p4328_p8 }
  0x91   : > { %p4330_p6 = pmov %p4328_p8 }
  0x92   : > { %2890 = dma.done.wait (%p4329_p13), [#allocation12], 1024  }
  0x93   : > { %2892 = vsyncadd (%p4330_p6), [#allocation12], 4294966272  ;;  %p464_p10 = scmp.lt.s32.totalorder %s3018_s6, 1  ;;  %v4303_v1 = vmov 0.0   ;;  %v468_v2 = vld [vmem:[%s3199_s28] sm:$0xff]  ;;  %v469_v3 = vld [vmem:[%s3199_s28 + $0x8] sm:$0xff]  ;;  %v524_v9 = vlaneseq }
  0x94   : > { %592 = vst [vmem:[#allocation2] sm:$0xf8] %v4303_v1  ;;  %593 = vst [vmem:[#allocation2 + $0x8] sm:$0xf8] %v4303_v1  ;;  %915 = vmatprep.mubr.f32.mxu0 %v4303_v1  ;;  %1257 = vmatprep.mubr.f32.mxu1 %v4303_v1  ;;  %v470_v4 = vld [vmem:[%s3199_s28 + $0x10] sm:$0xff]  ;;  %v471_v5 = vld [vmem:[%s3199_s28 + $0x18] sm:$0xff] }
  0x95   : > { %s465_s24 = scalar_select %p464_p10, %s3018_s6, 1  ;;  %v472_v6 = vld [vmem:[%s3199_s28 + $0x20] sm:$0xff]  ;;  %v473_v7 = vld [vmem:[%s3199_s28 + $0x28] sm:$0xff]  ;;  %v489_v8 = vadd.f32 %v470_v4, %v468_v2  ;;  %v474_v10 = vld [vmem:[%s3199_s28 + $0x30] sm:$0xff]  ;;  %v502_v12 = vadd.f32 %v471_v5, %v469_v3  ;;  %vm3234_vm0 = vcmp.lt.s32.totalorder %v524_v9, 256  ;;  %v3246_v59 = vshrl.u32 %v524_v9, 7 }
  0x96   : > { %v475_v11 = vld [vmem:[%s3199_s28 + $0x38] sm:$0xff]  ;;  %v542_v13 = vmax.f32 %v468_v2, %v472_v6  ;;  %v555_v14 = vmax.f32 %v469_v3, %v473_v7  ;;  %v476_v15 = vld [vmem:[%s3199_s28 + $0x40] sm:$0xff]  ;;  %v477_v16 = vld [vmem:[%s3199_s28 + $0x48] sm:$0xff]  ;;  %v543_v20 = vmax.f32 %v470_v4, %v474_v10  ;;  %v2922_v50 = vmov 1966171168   ;;  %s2923_s16 = smov 16  }
  0x97   : > { %s2387_s26 = sshll.u32 %s465_s24, 1  ;;  %v478_v17 = vld [vmem:[%s3199_s28 + $0x50] sm:$0xff]  ;;  %v490_v18 = vadd.f32 %v489_v8, %v472_v6  ;;  %v556_v21 = vmax.f32 %v471_v5, %v475_v11  ;;  %v479_v22 = vld [vmem:[%s3199_s28 + $0x58] sm:$0xff]  ;;  %v480_v23 = vld [vmem:[%s3199_s28 + $0x60] sm:$0xff]  ;;  %v503_v25 = vadd.f32 %v502_v12, %v473_v7  ;;  %v522_v51 = vunpack.c.l.s4 %v2922_v50  ;;  %s2924_s19 = smov 17  }
  0x98   : > { %s467_s12 = scalar_lea.vmem %s4276_s1, %s2387_s26  ;;  %v482_v24 = vld [vmem:[%s3199_s28 + $0x70] sm:$0xff]  ;;  %v544_v26 = vmax.f32 %v542_v13, %v476_v15  ;;  %v557_v27 = vmax.f32 %v555_v14, %v477_v16  ;;  %v481_v28 = vld [vmem:[%s3199_s28 + $0x68] sm:$0xff]  ;;  %v483_v29 = vld [vmem:[%s3199_s28 + $0x78] sm:$0xff]  ;;  %v545_v32 = vmax.f32 %v543_v20, %v478_v17  ;;  %s2925_s27 = smov 15   ;;  %vm826_vm9 = vcmask 588800  }
  0x99   : > { %v484_v30 = vld [vmem:[%s467_s12] sm:$0x3]  ;;  %v491_v31 = vadd.f32 %v490_v18, %v474_v10  ;;  %v558_v33 = vmax.f32 %v556_v21, %v479_v22  ;;  %v504_v34 = vadd.f32 %v503_v25, %v475_v11  ;;  %v523_v61 = vunpack.c.0.s8 %v522_v51  ;;  %s2926_s30 = smov 1   ;;  %s2927_s11 = smov 127   ;;  %v783_v19 = vld [vmem:[%s4279_s4 + $0x28] sm:$0xff] }
  0x9a   : > { %v546_v35 = vmax.f32 %v544_v26, %v480_v23  ;;  %v559_v36 = vmax.f32 %v557_v27, %v481_v28  ;;  %590 = vst.msk [vmem:[#allocation2 + $0x2] ss:$8 sm:$0x3] %vm3234_vm0, %v484_v30  ;;  %v547_v38 = vmax.f32 %v545_v32, %v482_v24  ;;  %s4301_s13 = smov 113   ;;  %s4297_s14 = smov 112   ;;  %v782_v27 = vld [vmem:[%s4279_s4 + $0x20] sm:$0xff] }
  0x9b   : > { %v492_v37 = vadd.f32 %v491_v31, %v476_v15  ;;  %v560_v39 = vmax.f32 %v558_v33, %v483_v29  ;;  %v505_v40 = vadd.f32 %v504_v34, %v477_v16  ;;  %v526_v7 = vsub.s32 %v523_v61, %v3246_v59  ;;  %s4299_s15 = smov 111   ;;  %v785_v30 = vld [vmem:[%s4279_s4 + $0x38] sm:$0xff]  ;;  %v778_v31 = vld [vmem:[%s4279_s4] sm:$0xff]  ;;  %v779_v32 = vld [vmem:[%s4279_s4 + $0x8] sm:$0xff]  ;;  %s4338_s25 = sld [smem:[#allocation24_spill]] }
  0x9c   : > { %v548_v42 = vmax.f32 %v546_v35, %v547_v38  ;;  %v780_v33 = vld [vmem:[%s4279_s4 + $0x10] sm:$0xff]  ;;  %v781_v34 = vld [vmem:[%s4279_s4 + $0x18] sm:$0xff]  ;;  %v3314_v35 = vand.u32 127, %v524_v9  ;;  %vm1189_vm10 = vcmask 261120   ;;  %s2437_s28 = sshll.u32 %s3018_s6, 11  ;;  %s4348_s12 = sld [smem:[#allocation25_spill]] }
  0x9d   : > { %v493_v41 = vadd.f32 %v492_v37, %v478_v17  ;;  %v561_v43 = vmax.f32 %v559_v36, %v560_v39  ;;  %v506_v44 = vadd.f32 %v505_v40, %v479_v22  ;;  %v3317_v36 = vsub.s32 0, %v3246_v59  ;;  %v3320_v38 = vld [vmem:[#allocation8] sm:$0xff]  ;;  %v3322_v39 = vld [vmem:[#allocation8 + $0x8] sm:$0xff]  ;;  %s2245_s6 = scalar_lea.sflag [#allocation7], %s3193_s2 }
  0x9e   : > { %v549_v46 = vrot.slane %v548_v42, 4  ;;  %v626_v37 = vsub.s32 1, %v3246_v59  ;;  %vm621_vm1 = vcmp.lt.s32.totalorder %v3314_v35, 16  ;;  %vm602_vm2 = vcmp.lt.s32.totalorder %v3314_v35, 17 }
  0x9f   : > { %v494_v45 = vadd.f32 %v493_v41, %v480_v23  ;;  %v562_v47 = vrot.slane %v561_v43, 4  ;;  %v507_v48 = vadd.f32 %v506_v44, %v481_v28  ;;  %v2931_v28 = vmov 0   ;;  %4333 = vst [vmem:[#allocation20_spill] sm:$0xff] %v3317_v36 }
  0xa0   : > { %v550_v52 = vmax.f32 %v548_v42, %v549_v46  ;;  %2680 = vset.pattern.permute.xlu1 %v2931_v28  ;;  %2679 = vset.pattern.permute.xlu0 %v2931_v28  ;;  %v3328_v42 = vrot.slane %v3322_v39, %v3317_v36  ;;  %v3331_v9 = vrot.slane %v3322_v39, %v626_v37  ;;  %vm640_vm3 = vcmp.lt.s32.totalorder %v3314_v35, 15 }
  0xa1   : > { %v495_v49 = vadd.f32 %v494_v45, %v482_v24  ;;  %v563_v53 = vmax.f32 %v561_v43, %v562_v47  ;;  %v508_v54 = vadd.f32 %v507_v48, %v483_v29  ;;  %v784_v29 = vld [vmem:[%s4279_s4 + $0x30] sm:$0xff]  ;;  %v3335_v43 = vrot.slane %v3320_v38, %v3317_v36 }
  0xa2   : > { %v551_v56 = vrot.slane %v550_v52, 2  ;;  %v3338_v44 = vrot.slane %v3320_v38, %v626_v37  ;;  %v645_v47 = vsub.s32 2, %v3246_v59  ;;  %v664_v48 = vsub.s32 3, %v3246_v59  ;;  %s4226_s10 = scalar_lea.hbm %s4348_s12, %s2437_s28 }
  0xa3   : > { %v496_v55 = vrot.slane %v495_v49, 4  ;;  %v564_v57 = vrot.slane %v563_v53, 2  ;;  %v509_v58 = vrot.slane %v508_v54, 4  ;;  %vm659_vm4 = vcmp.lt.s32.totalorder %v3314_v35, 1 }
  0xa4   : > { %v552_v62 = vmax.f32 %v550_v52, %v551_v56  ;;  %vm680_vm5 = vcmp.lt.s32.totalorder %v3314_v35, 127  ;;  %v723_v28 = vsub.s32 7, %v3246_v59  ;;  %vm699_vm6 = vcmp.lt.s32.totalorder %v3314_v35, 113 }
  0xa5   : > { %v497_v60 = vadd.f32 %v496_v55, %v495_v49  ;;  %v565_v63 = vmax.f32 %v563_v53, %v564_v57  ;;  %v510_v0 = vadd.f32 %v509_v58, %v508_v54  ;;  %vm718_vm7 = vcmp.lt.s32.totalorder %v3314_v35, 112 }
  0xa6   : > { %v553_v3 = vrot.slane %v552_v62, 1  ;;  %v3410_v37 = vrot.slane %v3322_v39, %v723_v28  ;;  %vm737_vm8 = vcmp.lt.s32.totalorder %v3314_v35, 111  ;;  %v1625_v35 = vld [vmem:[%s4282_s7 + $0x48] sm:$0xff] }
  0xa7   : > { %v498_v2 = vrot.slane %v497_v60, 2  ;;  %v566_v4 = vrot.slane %v565_v63, 1  ;;  %v511_v5 = vrot.slane %v510_v0, 2 }
  0xa8   : > { %v554_v8 = vmax.f32 %v552_v62, %v553_v3  ;;  %v3356_v62 = vrot.slane %v3320_v38, %v645_v47  ;;  %v3367_v3 = vrot.slane %v3322_v39, %v664_v48 }
  0xa9   : > { %v499_v6 = vadd.f32 %v498_v2, %v497_v60  ;;  %v567_v10 = vmax.f32 %v565_v63, %v566_v4  ;;  %v512_v11 = vadd.f32 %v511_v5, %v510_v0  ;;  %v685_v63 = vsub.s32 5, %v3246_v59 }
  0xaa   : > { %v3360_v0 = vrot.slane %v3322_v39, %v645_v47  ;;  %v3364_v2 = vrot.slane %v3320_v38, %v664_v48 }
  0xab   : > { %v500_v12 = vrot.slane %v499_v6, 1  ;;  %v570_v13 = vcombine.low %v554_v8, %v567_v10  ;;  %v513_v14 = vrot.slane %v512_v11, 1 }
  0xad   : > { %v501_v15 = vadd.f32 %v500_v12, %v499_v6  ;;  %v577_v16 = vrot.slane %v570_v13, %v526_v7  ;;  %v514_v17 = vadd.f32 %v513_v14, %v512_v11  ;;  %v3379_v11 = vrot.slane %v3320_v38, %v685_v63 }
  0xae   : > { %v3382_v12 = vrot.slane %v3322_v39, %v685_v63  ;;  %v754_v63 = vld [vmem:[#allocation10 + $0x10] sm:$0xff] }
  0xaf   : > { %v516_v18 = vmul.f32 0.015625, %v501_v15  ;;  %v584_v20 = vrot.slane %v577_v16, %v526_v7  ;;  %v517_v21 = vmul.f32 0.015625, %v514_v17 }
  0xb1   : > { %587 = vst.msk [vmem:[#allocation2 + $0x1] ss:$8 sm:$0x3] %vm3234_vm0, %v584_v20  ;;  %v520_v22 = vcombine.low %v516_v18, %v517_v21 }
  0xb3   : > { %v527_v23 = vrot.slane %v520_v22, %v526_v7 }
  0xb5   : > { %v534_v24 = vrot.slane %v527_v23, %v526_v7 }
  0xb7   : > { %540 = vst.msk [vmem:[#allocation2] ss:$8 sm:$0x3] %vm3234_vm0, %v534_v24  ;;  %v704_v24 = vsub.s32 6, %v3246_v59  ;;  %v3407_v59 = vrot.slane %v3320_v38, %v723_v28 }
  0xb9   : > { %4334 = vst [vmem:[#allocation21_spill] sm:$0xff] %v3407_v59 }
  0xbe   : > { %v3253_v25 = vld [vmem:[#allocation2] sm:$0xff]  ;;  %v3259_v26 = vld [vmem:[#allocation2 + $0x8] sm:$0xff] }
  0xbf   : > { %617 = vrot.lane.b32.xlu1 %v3253_v25, %s2923_s16  ;;  %596 = vrot.lane.b32.xlu0 %v3253_v25, %s2924_s19 }
  0xc3   : > { %619 = vrot.lane.b32.xlu1 %v3259_v26, %s2923_s16  ;;  %598 = vrot.lane.b32.xlu0 %v3259_v26, %s2924_s19 }
  0xc7   : > { %638 = vrot.lane.b32.xlu1 %v3259_v26, %s2925_s27  ;;  %636 = vrot.lane.b32.xlu0 %v3253_v25, %s2925_s27 }
  0xcb   : > { %657 = vrot.lane.b32.xlu1 %v3259_v26, %s2926_s30  ;;  %655 = vrot.lane.b32.xlu0 %v3253_v25, %s2926_s30 }
  0xcf   : > { %678 = vrot.lane.b32.xlu1 %v3259_v26, %s2927_s11  ;;  %676 = vrot.lane.b32.xlu0 %v3253_v25, %s2927_s11 }
  0xd3   : > { %697 = vrot.lane.b32.xlu1 %v3259_v26, %s4301_s13  ;;  %695 = vrot.lane.b32.xlu0 %v3253_v25, %s4301_s13 }
  0xd7   : > { %716 = vrot.lane.b32.xlu1 %v3259_v26, %s4297_s14  ;;  %714 = vrot.lane.b32.xlu0 %v3253_v25, %s4297_s14  ;;  %s4335_s14 = smov 113  }
  0xdb   : > { %735 = vrot.lane.b32.xlu1 %v3259_v26, %s4299_s15  ;;  %733 = vrot.lane.b32.xlu0 %v3253_v25, %s4299_s15 }
  0xdf   : > { %813 = vperm.xlu1 %2680, %v783_v19   ;;  %808 = vperm.xlu0 %2679, %v782_v27  }
  0xe3   : > { %818 = vperm.xlu1 %2680, %v784_v29   ;;  %823 = vperm.xlu0 %2679, %v785_v30  }
  0xe7   : > { %788 = vperm.xlu1 %2680, %v778_v31   ;;  %793 = vperm.xlu0 %2679, %v779_v32  }
  0xeb   : > { %798 = vperm.xlu1 %2680, %v780_v33   ;;  %803 = vperm.xlu0 %2679, %v781_v34   ;;  %v3400_v33 = vrot.slane %v3320_v38, %v704_v24  ;;  %v3403_v34 = vrot.slane %v3322_v39, %v704_v24 }
 0x131   : > { %v618_v40 = vpop.permute.xlu1 %617  ;;  %v597_v41 = vpop.permute.xlu0 %596 }
 0x135   : > { %v620_v45 = vpop.permute.xlu1 %619  ;;  %v599_v46 = vpop.permute.xlu0 %598 }
 0x136   : > { %v623_v49 = vsel %vm621_vm1, %v620_v45, %v618_v40  ;;  %v604_v50 = vsel %vm602_vm2, %v599_v46, %v597_v41  ;;  %v603_v51 = vsel %vm602_vm2, %v597_v41, %v599_v46  ;;  %v622_v52 = vsel %vm621_vm1, %v618_v40, %v620_v45 }
 0x137   : > { %v614_v53 = vmul.f32 %v3328_v42, %v603_v51  ;;  %v633_v54 = vmul.f32 %v3331_v9, %v622_v52  ;;  %v613_v55 = vmul.f32 %v3335_v43, %v604_v50  ;;  %v632_v56 = vmul.f32 %v3338_v44, %v623_v49  ;;  %v2389_v49 = vld [vmem:[#allocation8 + $0x18] ss:$0 sm:$0xff]  ;;  %v2388_v52 = vld [vmem:[#allocation8 + $0x10] ss:$0 sm:$0xff] }
 0x139   : > { %v639_v57 = vpop.permute.xlu1 %638  ;;  %v637_v58 = vpop.permute.xlu0 %636  ;;  %v2438_v60 = vpack.c.bf16 %v633_v54, %v614_v53  ;;  %v2440_v61 = vpack.c.bf16 %v632_v56, %v613_v55 }
 0x13a   : > { %v641_v4 = vsel %vm640_vm3, %v637_v58, %v639_v57  ;;  %v642_v5 = vsel %vm640_vm3, %v639_v57, %v637_v58 }
 0x13b   : > { %2439 = vmatprep.subr.bf16.mxu0 %v2438_v60  ;;  %v651_v13 = vmul.f32 %v3356_v62, %v642_v5  ;;  %v652_v14 = vmul.f32 %v3360_v0, %v641_v4  ;;  %v752_v60 = vld [vmem:[#allocation10] sm:$0xff]  ;;  %v755_v4 = vld [vmem:[#allocation10 + $0x18] sm:$0xff] }
 0x13c   : > { %2441 = vmatpush1.bf16.msra.mxu0 %v2440_v61  ;;  %v753_v61 = vld [vmem:[#allocation10 + $0x8] sm:$0xff]  ;;  %v756_v5 = vld [vmem:[#allocation10 + $0x20] sm:$0xff] }
 0x13d   : > { %v658_v6 = vpop.permute.xlu1 %657  ;;  %v656_v7 = vpop.permute.xlu0 %655 }
 0x13e   : > { %v660_v8 = vsel %vm659_vm4, %v656_v7, %v658_v6  ;;  %v661_v10 = vsel %vm659_vm4, %v658_v6, %v656_v7  ;;  %v757_v6 = vld [vmem:[#allocation10 + $0x28] sm:$0xff]  ;;  %v758_v7 = vld [vmem:[#allocation10 + $0x30] sm:$0xff] }
 0x13f   : > { %v670_v15 = vmul.f32 %v3364_v2, %v661_v10  ;;  %v671_v16 = vmul.f32 %v3367_v3, %v660_v8  ;;  %v759_v8 = vld [vmem:[#allocation10 + $0x38] sm:$0xff] }
 0x141   : > { %v679_v17 = vpop.permute.xlu1 %678  ;;  %v677_v18 = vpop.permute.xlu0 %676  ;;  %v2442_v20 = vpack.c.bf16 %v671_v16, %v652_v14  ;;  %v2444_v21 = vpack.c.bf16 %v670_v15, %v651_v13 }
 0x142   : > { %v681_v22 = vsel %vm680_vm5, %v677_v18, %v679_v17  ;;  %v682_v23 = vsel %vm680_vm5, %v679_v17, %v677_v18 }
 0x143   : > { %v691_v19 = vmul.f32 %v3379_v11, %v681_v22  ;;  %v692_v27 = vmul.f32 %v3382_v12, %v682_v23  ;;  %2443 = vmatprep.subr.bf16.mxu0 %v2442_v20 }
 0x144   : > { %2445 = vmatpush1.bf16.msra.mxu0 %v2444_v21 }
 0x145   : > { %v698_v29 = vpop.permute.xlu1 %697  ;;  %v696_v30 = vpop.permute.xlu0 %695  ;;  %v2446_v31 = vpack.c.bf16 %v692_v27, %v3259_v26  ;;  %v2448_v32 = vpack.c.bf16 %v691_v19, %v3253_v25 }
 0x146   : > { %v700_v26 = vsel %vm699_vm6, %v696_v30, %v698_v29  ;;  %v701_v25 = vsel %vm699_vm6, %v698_v29, %v696_v30 }
 0x147   : > { %2447 = vmatprep.subr.bf16.mxu0 %v2446_v31  ;;  %v710_v38 = vmul.f32 %v3400_v33, %v700_v26  ;;  %v711_v39 = vmul.f32 %v3403_v34, %v701_v25 }
 0x148   : > { %2449 = vmatpush1.bf16.msra.mxu0 %v2448_v32 }
 0x149   : > { %v717_v40 = vpop.permute.xlu1 %716  ;;  %v715_v41 = vpop.permute.xlu0 %714 }
 0x14a   : > { %v719_v45 = vsel %vm718_vm7, %v715_v41, %v717_v40  ;;  %v720_v46 = vsel %vm718_vm7, %v717_v40, %v715_v41 }
 0x14b   : > { %v729_v47 = vmul.f32 %v3407_v59, %v719_v45  ;;  %v730_v48 = vmul.f32 %v3410_v37, %v720_v46 }
 0x14d   : > { %v736_v50 = vpop.permute.xlu1 %735  ;;  %v2450_v51 = vpack.c.bf16 %v730_v48, %v711_v39  ;;  %v734_v53 = vpop.permute.xlu0 %733  ;;  %v2452_v54 = vpack.c.bf16 %v729_v47, %v710_v38 }
 0x14e   : > { %v738_v55 = vsel %vm737_vm8, %v734_v53, %v736_v50  ;;  %v739_v56 = vsel %vm737_vm8, %v736_v50, %v734_v53 }
 0x14f   : > { %2451 = vmatprep.subr.bf16.mxu0 %v2450_v51  ;;  %v749_v57 = vmul.f32 %v2389_v49, %v739_v56  ;;  %v748_v58 = vmul.f32 %v2388_v52, %v738_v55 }
 0x150   : > { %2453 = vmatpush1.bf16.msra.mxu0 %v2452_v54 }
 0x151   : > { %867 = vmatprep.subr.mxu0 %v749_v57 }
 0x154   : > { %868 = vmatpush1.msra.mxu0 %v748_v58 }
 0x155   : > { %2390 = vmatmul.mubr.msk.f32.vlgmr.msra.gmra.mrb[0].mxu0 %vm826_vm9, %v752_v60 }
 0x156   : > { %921 = vmatprep.mubr.f32.mxu0 %v4303_v1 }
 0x159   : > { %2391 = vmatmul.mubr.msk.f32.gmra.mrb[2].mxu0 %vm826_vm9, %v753_v61 }
 0x15a   : > { %927 = vmatprep.mubr.f32.mxu0 %v4303_v1 }
 0x15d   : > { %2392 = vmatmul.mubr.msk.f32.gmra.mrb[4].mxu0 %vm826_vm9, %v754_v63 }
 0x15e   : > { %933 = vmatprep.mubr.f32.mxu0 %v4303_v1  ;;  %v814_v10 = vpop.permute.xlu1 %813  ;;  %v809_v13 = vpop.permute.xlu0 %808 }
 0x161   : > { %2393 = vmatmul.mubr.msk.f32.gmra.mrb[6].mxu0 %vm826_vm9, %v755_v4 }
 0x162   : > { %939 = vmatprep.mubr.f32.mxu0 %v4303_v1  ;;  %v3445_v14 = vpop.permute.xlu1 %818  ;;  %v3447_v15 = vpop.permute.xlu0 %823 }
 0x165   : > { %2394 = vmatmul.mubr.msk.f32.gmra.mrb[8].mxu0 %vm826_vm9, %v756_v5 }
 0x166   : > { %945 = vmatprep.mubr.f32.mxu0 %v4303_v1  ;;  %v789_v16 = vpop.permute.xlu1 %788  ;;  %v794_v20 = vpop.permute.xlu0 %793 }
 0x169   : > { %2395 = vmatmul.mubr.msk.f32.gmra.mrb[10].mxu0 %vm826_vm9, %v757_v6 }
 0x16a   : > { %951 = vmatprep.mubr.f32.mxu0 %v4303_v1  ;;  %v799_v32 = vpop.permute.xlu1 %798  ;;  %v804_v45 = vpop.permute.xlu0 %803 }
 0x16d   : > { %2396 = vmatmul.mubr.msk.f32.gmra.mrb[12].mxu0 %vm826_vm9, %v758_v7 }
 0x16e   : > { %957 = vmatprep.mubr.f32.mxu0 %v4303_v1 }
 0x171   : > { %2397 = vmatmul.mubr.msk.f32.gmra.mrb[14].mxu0 %vm826_vm9, %v759_v8  ;;  %v1188_v8 = vld [vmem:[%s4280_s5] sm:$0xff] }
 0x172   : > { %1961 = vmatprep.mubr.f32.mxu0 %v4303_v1 }
 0x228   : > { %v917_v17 = vpop.f32.mrb[0].mxu0 }
 0x229   : > { %v919_v18 = vpop.f32.mrb[1].mxu0  ;;  %v918_v21 = vadd.f32 %v917_v17, %v789_v16 }
 0x22a   : > { %v920_v22 = vadd.f32 %v919_v18, %v789_v16 }
 0x22b   : > { %v964_v28 = vmax.f32 %v918_v21, 0.0 }
 0x22c   : > { %v923_v23 = vpop.f32.mrb[2].mxu0  ;;  %v965_v30 = vmax.f32 %v920_v22, 0.0 }
 0x22d   : > { %v924_v24 = vadd.f32 %v923_v23, %v794_v20  ;;  %v925_v19 = vpop.f32.mrb[3].mxu0 }
 0x22e   : > { %v926_v27 = vadd.f32 %v925_v19, %v794_v20 }
 0x22f   : > { %v966_v29 = vmax.f32 %v924_v24, 0.0 }
 0x230   : > { %v967_v31 = vmax.f32 %v926_v27, 0.0  ;;  %v929_v26 = vpop.f32.mrb[4].mxu0 }
 0x231   : > { %v931_v25 = vpop.f32.mrb[5].mxu0  ;;  %v2456_v40 = vpack.c.bf16 %v966_v29, %v964_v28  ;;  %v930_v46 = vadd.f32 %v929_v26, %v799_v32 }
 0x232   : > { %v2454_v41 = vpack.c.bf16 %v967_v31, %v965_v30  ;;  %v932_v38 = vadd.f32 %v931_v25, %v799_v32 }
 0x233   : > { %v968_v50 = vmax.f32 %v930_v46, 0.0 }
 0x234   : > { %v935_v39 = vpop.f32.mrb[6].mxu0  ;;  %2455 = vmatprep.subr.bf16.mxu1 %v2454_v41  ;;  %v969_v52 = vmax.f32 %v932_v38, 0.0 }
 0x235   : > { %v936_v47 = vadd.f32 %v935_v39, %v804_v45  ;;  %v937_v48 = vpop.f32.mrb[7].mxu0  ;;  %2457 = vmatpush1.bf16.msra.mxu1 %v2456_v40 }
 0x236   : > { %v938_v49 = vadd.f32 %v937_v48, %v804_v45 }
 0x237   : > { %v970_v51 = vmax.f32 %v936_v47, 0.0 }
 0x238   : > { %v971_v53 = vmax.f32 %v938_v49, 0.0  ;;  %v941_v54 = vpop.f32.mrb[8].mxu0 }
 0x239   : > { %v3449_v55 = vadd.f32 %v941_v54, %v809_v13  ;;  %v943_v56 = vpop.f32.mrb[9].mxu0  ;;  %v2460_v57 = vpack.c.bf16 %v970_v51, %v968_v50 }
 0x23a   : > { %v2458_v58 = vpack.c.bf16 %v971_v53, %v969_v52  ;;  %v3451_v60 = vadd.f32 %v943_v56, %v809_v13 }
 0x23b   : > { %v3454_v61 = vmul.f32 0.70710677, %v3449_v55 }
 0x23c   : > { %v3457_v63 = vmul.f32 0.70710677, %v3451_v60  ;;  %v947_v4 = vpop.f32.mrb[10].mxu0  ;;  %2459 = vmatprep.subr.bf16.mxu1 %v2458_v58 }
 0x23d   : > { %v980_v5 = vand.u32 2147483647, %v3454_v61  ;;  %v3460_v6 = vadd.f32 %v947_v4, %v814_v10  ;;  %v949_v7 = vpop.f32.mrb[11].mxu0  ;;  %2461 = vmatpush1.bf16.msra.mxu1 %v2460_v57  ;;  %vm1140_vm11 = vcmp.ge.f32.partialorder %v3454_v61, 0.0 }
 0x23e   : > { %v981_v13 = vand.u32 2147483647, %v3457_v63  ;;  %v3466_v16 = vadd.f32 %v949_v7, %v814_v10  ;;  %vm1141_vm13 = vcmp.ge.f32.partialorder %v3457_v63, 0.0 }
 0x23f   : > { %v988_v17 = vmul.f32 0.3275911, %v980_v5  ;;  %v3469_v18 = vmul.f32 0.70710677, %v3460_v6  ;;  %v1092_v45 = vsub.f32 0.0, %v980_v5 }
 0x240   : > { %v989_v20 = vmul.f32 0.3275911, %v981_v13  ;;  %v3472_v21 = vmul.f32 0.70710677, %v3466_v16  ;;  %2414 = vmatmul.mubr.msk.f32.vlgmr.msra.gmra.mrb[0].mxu1 %vm1189_vm10, %v1188_v8  ;;  %v953_v24 = vpop.f32.mrb[12].mxu0  ;;  %v1093_v7 = vsub.f32 0.0, %v981_v13 }
 0x241   : > { %v996_v22 = vadd.f32 1.0, %v988_v17  ;;  %v982_v23 = vand.u32 2147483647, %v3469_v18  ;;  %v955_v10 = vpop.f32.mrb[13].mxu0  ;;  %v3481_v32 = vadd.f32 %v953_v24, %v3445_v14  ;;  %v1100_v50 = vmul.f32 %v1092_v45, %v980_v5 }
 0x242   : > { %v997_v19 = vadd.f32 1.0, %v989_v20  ;;  %v3477_v27 = vand.u32 2147483647, %v3472_v21  ;;  %v3487_v41 = vadd.f32 %v955_v10, %v3445_v14  ;;  %vm1142_vm12 = vcmp.ge.f32.partialorder %v3469_v18, 0.0 }
 0x243   : > { %2681 = vrcp.f32 %v996_v22  ;;  %v990_v28 = vmul.f32 0.3275911, %v982_v23  ;;  %v3484_v40 = vmul.f32 0.70710677, %v3481_v32  ;;  %v1094_v51 = vsub.f32 0.0, %v982_v23 }
 0x244   : > { %2683 = vrcp.f32 %v997_v19  ;;  %v991_v29 = vmul.f32 0.3275911, %v3477_v27  ;;  %v959_v30 = vpop.f32.mrb[14].mxu0  ;;  %v3497_v47 = vmul.f32 0.70710677, %v3487_v41  ;;  %vm1143_vm14 = vcmp.ge.f32.partialorder %v3472_v21, 0.0 }
 0x245   : > { %v998_v31 = vadd.f32 1.0, %v990_v28  ;;  %v961_v26 = vpop.f32.mrb[15].mxu0  ;;  %v3490_v46 = vand.u32 2147483647, %v3484_v40  ;;  %v3493_v38 = vadd.f32 %v959_v30, %v3447_v15  ;;  %v1108_v17 = vmul.f32 1.442695, %v1100_v50 }
 0x246   : > { %v999_v25 = vadd.f32 1.0, %v991_v29  ;;  %v3503_v49 = vadd.f32 %v961_v26, %v3447_v15  ;;  %v3512_v58 = vand.u32 2147483647, %v3497_v47  ;;  %v1102_v22 = vmul.f32 %v1094_v51, %v982_v23 }
 0x247   : > { %2685 = vrcp.f32 %v998_v31  ;;  %v992_v39 = vmul.f32 0.3275911, %v3490_v46  ;;  %v3500_v48 = vmul.f32 0.70710677, %v3493_v38  ;;  %vm1144_vm15 = vcmp.ge.f32.partialorder %v3484_v40, 0.0 }
 0x248   : > { %2687 = vrcp.f32 %v999_v25  ;;  %v3516_v5 = vmul.f32 0.70710677, %v3503_v49  ;;  %v993_v31 = vmul.f32 0.3275911, %v3512_v58  ;;  %v1101_v25 = vmul.f32 %v1093_v7, %v981_v13 }
 0x249   : > { %v1000_v52 = vadd.f32 1.0, %v992_v39  ;;  %v3506_v53 = vand.u32 2147483647, %v3500_v48  ;;  %v1112_v50 = vmul.f32 1.442695, %v1102_v22  ;;  %vm1146_vm0 = vcmp.ge.f32.partialorder %v3500_v48, 0.0 }
 0x24a   : > { %v3524_v39 = vand.u32 2147483647, %v3516_v5  ;;  %v1168_v40 = vmul.f32 0.5, %v3481_v32  ;;  %v1170_v48 = vmul.f32 0.5, %v3493_v38  ;;  %vm1145_vm9 = vcmp.ge.f32.partialorder %v3497_v47, 0.0 }
 0x24b   : > { %2689 = vrcp.f32 %v1000_v52  ;;  %v994_v4 = vmul.f32 0.3275911, %v3506_v53 }
 0x24c   : > { %v995_v13 = vmul.f32 0.3275911, %v3524_v39 }
 0x24d   : > { %v2682_v14 = vpop.eup %2681  ;;  %v1002_v24 = vadd.f32 1.0, %v994_v4 }
 0x24e   : > { %v3508_v54 = vpop.eup %2683  ;;  %v1020_v56 = vmul.f32 1.0614054, %v2682_v14 }
 0x24f   : > { %v1021_v57 = vmul.f32 1.0614054, %v3508_v54  ;;  %2691 = vrcp.f32 %v1002_v24 }
 0x250   : > { %v2398_v15 = vadd.f32 -1.4531521, %v1020_v56  ;;  %2693 = vpow2.f32 %v1108_v17  ;;  %v1110_v17 = vmul.f32 1.442695, %v1101_v25 }
 0x251   : > { %v2686_v8 = vpop.eup %2685  ;;  %v2399_v20 = vadd.f32 -1.4531521, %v1021_v57  ;;  %2695 = vpow2.f32 %v1112_v50 }
 0x252   : > { %v3518_v19 = vpop.eup %2687  ;;  %v1036_v10 = vmul.f32 %v2682_v14, %v2398_v15  ;;  %v1022_v28 = vmul.f32 1.0614054, %v2686_v8  ;;  %v1095_v15 = vsub.f32 0.0, %v3477_v27 }
 0x253   : > { %v1037_v29 = vmul.f32 %v3508_v54, %v2399_v20  ;;  %v1023_v30 = vmul.f32 1.0614054, %v3518_v19  ;;  %v1001_v20 = vadd.f32 1.0, %v993_v31 }
 0x254   : > { %v1044_v26 = vadd.f32 1.4214138, %v1036_v10  ;;  %v2400_v45 = vadd.f32 -1.4531521, %v1022_v28 }
 0x255   : > { %v1045_v23 = vadd.f32 1.4214138, %v1037_v29  ;;  %v2401_v51 = vadd.f32 -1.4531521, %v1023_v30  ;;  %v3530_v7 = vpop.eup %2689  ;;  %2697 = vrcp.f32 %v1001_v20 }
 0x256   : > { %v1052_v52 = vmul.f32 %v2682_v14, %v1044_v26  ;;  %v1038_v56 = vmul.f32 %v2686_v8, %v2400_v45  ;;  %v1024_v26 = vmul.f32 1.0614054, %v3530_v7  ;;  %2699 = vpow2.f32 %v1110_v17 }
 0x257   : > { %v1053_v57 = vmul.f32 %v3508_v54, %v1045_v23  ;;  %v1039_v4 = vmul.f32 %v3518_v19, %v2401_v51  ;;  %v1103_v23 = vmul.f32 %v1095_v15, %v3477_v27 }
 0x258   : > { %v2406_v24 = vadd.f32 -0.28449672, %v1052_v52  ;;  %v1046_v10 = vadd.f32 1.4214138, %v1038_v56  ;;  %v1003_v52 = vadd.f32 1.0, %v995_v13 }
 0x259   : > { %v2407_v28 = vadd.f32 -0.28449672, %v1053_v57  ;;  %v1047_v22 = vadd.f32 1.4214138, %v1039_v4  ;;  %v3535_v56 = vpop.eup %2691  ;;  %v2402_v25 = vadd.f32 -1.4531521, %v1024_v26 }
 0x25a   : > { %v1068_v29 = vmul.f32 %v2682_v14, %v2406_v24  ;;  %v1054_v30 = vmul.f32 %v2686_v8, %v1046_v10  ;;  %v1026_v24 = vmul.f32 1.0614054, %v3535_v56  ;;  %v2694_v10 = vpop.eup %2693  ;;  %v1114_v36 = vmul.f32 1.442695, %v1103_v23 }
 0x25b   : > { %v1055_v45 = vmul.f32 %v3518_v19, %v1047_v22  ;;  %v1069_v1 = vmul.f32 %v3508_v54, %v2407_v28  ;;  %2701 = vrcp.f32 %v1003_v52  ;;  %v1040_v15 = vmul.f32 %v3530_v7, %v2402_v25  ;;  %v2696_v17 = vpop.eup %2695 }
 0x25c   : > { %v1076_v51 = vadd.f32 0.2548296, %v1068_v29  ;;  %v2408_v31 = vadd.f32 -0.28449672, %v1054_v30  ;;  %v2404_v28 = vadd.f32 -1.4531521, %v1026_v24  ;;  %2703 = vpow2.f32 %v1114_v36 }
 0x25d   : > { %v2409_v4 = vadd.f32 -0.28449672, %v1055_v45  ;;  %v1077_v27 = vadd.f32 0.2548296, %v1069_v1  ;;  %v1048_v45 = vadd.f32 1.4214138, %v1040_v15 }
 0x25e   : > { %v1084_v50 = vmul.f32 %v2682_v14, %v1076_v51  ;;  %v1070_v57 = vmul.f32 %v2686_v8, %v2408_v31  ;;  %v1042_v52 = vmul.f32 %v3535_v56, %v2404_v28  ;;  %v1096_v36 = vsub.f32 0.0, %v3490_v46 }
 0x25f   : > { %v1071_v29 = vmul.f32 %v3518_v19, %v2409_v4  ;;  %v1085_v26 = vmul.f32 %v3508_v54, %v1077_v27  ;;  %v3543_v23 = vpop.eup %2697 }
 0x260   : > { %v1124_v22 = vmul.f32 %v2694_v10, %v1084_v50  ;;  %v1078_v59 = vadd.f32 0.2548296, %v1070_v57  ;;  %v1025_v54 = vmul.f32 1.0614054, %v3543_v23  ;;  %v1050_v27 = vadd.f32 1.4214138, %v1042_v52 }
 0x261   : > { %v1079_v31 = vadd.f32 0.2548296, %v1071_v29 }
 0x262   : > { %v1132_v20 = vsub.f32 1.0, %v1124_v22  ;;  %v1086_v13 = vmul.f32 %v2686_v8, %v1078_v59  ;;  %v2700_v59 = vpop.eup %2699  ;;  %v1164_v8 = vmul.f32 0.5, %v3449_v55  ;;  %v1056_v22 = vmul.f32 %v3530_v7, %v1048_v45 }
 0x263   : > { %v1125_v61 = vmul.f32 %v2700_v59, %v1085_v26  ;;  %v1087_v10 = vmul.f32 %v3518_v19, %v1079_v31  ;;  %v1166_v55 = vmul.f32 0.5, %v3460_v6  ;;  %v2403_v28 = vadd.f32 -1.4531521, %v1025_v54 }
 0x264   : > { %v1148_v14 = vsub.f32 0.0, %v1132_v20  ;;  %v1126_v30 = vmul.f32 %v2696_v17, %v1086_v13  ;;  %v1098_v13 = vsub.f32 0.0, %v3506_v53  ;;  %v1058_v26 = vmul.f32 %v3535_v56, %v1050_v27 }
 0x265   : > { %v3552_v4 = vpop.eup %2701  ;;  %v1133_v19 = vsub.f32 1.0, %v1125_v61 }
 0x266   : > { %v1156_v51 = vsel %vm1140_vm11, %v1132_v20, %v1148_v14  ;;  %v1134_v1 = vsub.f32 1.0, %v1126_v30  ;;  %v1104_v20 = vmul.f32 %v1096_v36, %v3490_v46  ;;  %v2704_v18 = vpop.eup %2703  ;;  %v1027_v17 = vmul.f32 1.0614054, %v3552_v4 }
 0x267   : > { %v1172_v25 = vadd.f32 1.0, %v1156_v51  ;;  %v1127_v14 = vmul.f32 %v2704_v18, %v1087_v10  ;;  %v2410_v30 = vadd.f32 -0.28449672, %v1056_v22  ;;  %v1106_v45 = vmul.f32 %v1098_v13, %v3506_v53 }
 0x268   : > { %v1150_v50 = vsub.f32 0.0, %v1134_v1  ;;  %v1116_v6 = vmul.f32 1.442695, %v1104_v20  ;;  %v1041_v46 = vmul.f32 %v3543_v23, %v2403_v28  ;;  %v2405_v51 = vadd.f32 -1.4531521, %v1027_v17 }
 0x269   : > { %v3548_v57 = vmul.f32 %v1172_v25, %v1164_v8  ;;  %v1135_v31 = vsub.f32 1.0, %v1127_v14  ;;  %v1072_v52 = vmul.f32 %v3530_v7, %v2410_v30  ;;  %v2412_v59 = vadd.f32 -0.28449672, %v1058_v26 }
 0x26a   : > { %v1158_v24 = vsel %vm1142_vm12, %v1134_v1, %v1150_v50  ;;  %v1149_v1 = vsub.f32 0.0, %v1133_v19  ;;  %2705 = vpow2.f32 %v1116_v6  ;;  %v1120_v8 = vmul.f32 1.442695, %v1106_v45 }
 0x26b   : > { %v1174_v15 = vadd.f32 1.0, %v1158_v24  ;;  %1288 = vrot.lane.b32.xlu1 %v3548_v57, %s2924_s19  ;;  %v1049_v53 = vadd.f32 1.4214138, %v1041_v46  ;;  %v1043_v25 = vmul.f32 %v3552_v4, %v2405_v51  ;;  %v1151_v50 = vsub.f32 0.0, %v1135_v31 }
 0x26c   : > { %v1157_v36 = vsel %vm1141_vm13, %v1133_v19, %v1149_v1  ;;  %v1080_v61 = vadd.f32 0.2548296, %v1072_v52  ;;  %v1074_v54 = vmul.f32 %v3535_v56, %v2412_v59  ;;  %v1097_v24 = vsub.f32 0.0, %v3512_v58 }
 0x26d   : > { %v3561_v29 = vmul.f32 %v1174_v15, %v1166_v55  ;;  %2707 = vpow2.f32 %v1120_v8  ;;  %v1173_v10 = vadd.f32 1.0, %v1157_v36  ;;  %v1057_v63 = vmul.f32 %v3543_v23, %v1049_v53 }
 0x26e   : > { %v1159_v22 = vsel %vm1143_vm14, %v1135_v31, %v1151_v50  ;;  %v1088_v27 = vmul.f32 %v3530_v7, %v1080_v61  ;;  %v1082_v55 = vadd.f32 0.2548296, %v1074_v54  ;;  %v1051_v15 = vadd.f32 1.4214138, %v1043_v25 }
 0x26f   : > { %1290 = vrot.lane.b32.xlu0 %v3561_v29, %s2924_s19  ;;  %1328 = vrot.lane.b32.xlu1 %v3548_v57, %s2923_s16  ;;  %v1165_v20 = vmul.f32 0.5, %v3451_v60  ;;  %v1105_v13 = vmul.f32 %v1097_v24, %v3512_v58  ;;  %v1099_v18 = vsub.f32 0.0, %v3524_v39  ;;  %v1175_v17 = vadd.f32 1.0, %v1159_v22 }
 0x270   : > { %v2411_v7 = vadd.f32 -0.28449672, %v1057_v63  ;;  %v1090_v14 = vmul.f32 %v3535_v56, %v1082_v55  ;;  %v1059_v60 = vmul.f32 %v3552_v4, %v1051_v15  ;;  %v1167_v58 = vmul.f32 0.5, %v3466_v16 }
 0x271   : > { %v3594_v28 = vmul.f32 %v1173_v10, %v1165_v20  ;;  %v1118_v30 = vmul.f32 1.442695, %v1105_v13  ;;  %v1107_v26 = vmul.f32 %v1099_v18, %v3524_v39  ;;  %vm1147_vm11 = vcmp.ge.f32.partialorder %v3516_v5, 0.0 }
 0x272   : > { %v3604_v45 = vmul.f32 %v1175_v17, %v1167_v58  ;;  %v1073_v51 = vmul.f32 %v3543_v23, %v2411_v7  ;;  %v2413_v1 = vadd.f32 -0.28449672, %v1059_v60 }
 0x273   : > { %1330 = vrot.lane.b32.xlu0 %v3561_v29, %s2923_s16  ;;  %1368 = vrot.lane.b32.xlu1 %v3548_v57, %s2925_s27  ;;  %2709 = vpow2.f32 %v1118_v30  ;;  %v1122_v31 = vmul.f32 1.442695, %v1107_v26  ;;  %v1264_v30 = vld [vmem:[#allocation4] sm:$0x1] }
 0x274   : > { %v2706_v21 = vpop.eup %2705  ;;  %v1081_v39 = vadd.f32 0.2548296, %v1073_v51  ;;  %v1075_v59 = vmul.f32 %v3552_v4, %v2413_v1  ;;  %v1712_v51 = vld [vmem:[%s4283_s8] sm:$0xff] }
 0x275   : > { %v1128_v19 = vmul.f32 %v2706_v21, %v1088_v27  ;;  %2711 = vpow2.f32 %v1122_v31  ;;  %v1169_v21 = vmul.f32 0.5, %v3487_v41  ;;  %v1617_v41 = vld [vmem:[%s4282_s7 + $0x8] sm:$0xff]  ;;  %v1715_v31 = vld [vmem:[%s4283_s8 + $0x18] sm:$0xff] }
 0x276   : > { %v1089_v53 = vmul.f32 %v3543_v23, %v1081_v39  ;;  %v1083_v36 = vadd.f32 0.2548296, %v1075_v59  ;;  %1848 = vmatprep.mubr.f32.mxu1 %v1617_v41 }
 0x277   : > { %1370 = vrot.lane.b32.xlu0 %v3561_v29, %s2925_s27  ;;  %1408 = vrot.lane.b32.xlu1 %v3548_v57, %s2926_s30  ;;  %v2708_v6 = vpop.eup %2707  ;;  %v1136_v46 = vsub.f32 1.0, %v1128_v19  ;;  %v1171_v19 = vmul.f32 0.5, %v3503_v49 }
 0x278   : > { %v1130_v56 = vmul.f32 %v2708_v6, %v1090_v14  ;;  %v1091_v10 = vmul.f32 %v3552_v4, %v1083_v36 }
 0x279   : > { %v1152_v16 = vsub.f32 0.0, %v1136_v46 }
 0x27a   : > { %v1138_v52 = vsub.f32 1.0, %v1130_v56 }
 0x27b   : > { %1410 = vrot.lane.b32.xlu0 %v3561_v29, %s2926_s30  ;;  %1456 = vrot.lane.b32.xlu1 %v3548_v57, %s2927_s11  ;;  %v1160_v8 = vsel %vm1144_vm15, %v1136_v46, %v1152_v16  ;;  %v1713_v46 = vld [vmem:[%s4283_s8 + $0x8] sm:$0xff]  ;;  %v1714_v16 = vld [vmem:[%s4283_s8 + $0x10] sm:$0xff] }
 0x27c   : > { %v1154_v25 = vsub.f32 0.0, %v1138_v52  ;;  %v1176_v61 = vadd.f32 1.0, %v1160_v8 }
 0x27d   : > { %v2710_v50 = vpop.eup %2709 }
 0x27e   : > { %v1129_v54 = vmul.f32 %v2710_v50, %v1089_v53  ;;  %v1162_v24 = vsel %vm1146_vm0, %v1138_v52, %v1154_v25  ;;  %v3629_v63 = vmul.f32 %v1176_v61, %v1168_v40  ;;  %v1717_v53 = vld [vmem:[%s4283_s8 + $0x28] sm:$0xff]  ;;  %v1716_v50 = vld [vmem:[%s4283_s8 + $0x20] sm:$0xff] }
 0x27f   : > { %1458 = vrot.lane.b32.xlu0 %v3561_v29, %s2927_s11  ;;  %1296 = vrot.lane.b32.xlu1 %v3594_v28, %s2924_s19  ;;  %v2712_v23 = vpop.eup %2711  ;;  %v1178_v22 = vadd.f32 1.0, %v1162_v24 }
 0x280   : > { %v1137_v27 = vsub.f32 1.0, %v1129_v54  ;;  %v1131_v55 = vmul.f32 %v2712_v23, %v1091_v10 }
 0x281   : > { %v3636_v32 = vmul.f32 %v1178_v22, %v1170_v48  ;;  %v1719_v22 = vld [vmem:[%s4283_s8 + $0x38] sm:$0xff] }
 0x282   : > { %v1153_v4 = vsub.f32 0.0, %v1137_v27  ;;  %v1139_v15 = vsub.f32 1.0, %v1131_v55 }
 0x283   : > { %1298 = vrot.lane.b32.xlu0 %v3604_v45, %s2924_s19  ;;  %1336 = vrot.lane.b32.xlu1 %v3594_v28, %s2923_s16 }
 0x284   : > { %v1161_v20 = vsel %vm1145_vm9, %v1137_v27, %v1153_v4  ;;  %v1155_v38 = vsub.f32 0.0, %v1139_v15  ;;  %v1718_v4 = vld [vmem:[%s4283_s8 + $0x30] sm:$0xff] }
 0x285   : > { %v1177_v13 = vadd.f32 1.0, %v1161_v20  ;;  %v2043_v20 = vld [vmem:[%s4338_s25 + $0x8] sm:$0xff] }
 0x286   : > { %v1163_v18 = vsel %vm1147_vm11, %v1139_v15, %v1155_v38 }
 0x287   : > { %1338 = vrot.lane.b32.xlu0 %v3604_v45, %s2923_s16  ;;  %1376 = vrot.lane.b32.xlu1 %v3594_v28, %s2925_s27  ;;  %v3653_v47 = vmul.f32 %v1177_v13, %v1169_v21  ;;  %v1179_v17 = vadd.f32 1.0, %v1163_v18  ;;  %v2042_v18 = vld [vmem:[%s4338_s25] sm:$0xff] }
 0x289   : > { %v3660_v5 = vmul.f32 %v1179_v17, %v1171_v19  ;;  %v2045_v17 = vld [vmem:[%s4338_s25 + $0x18] sm:$0xff] }
 0x28b   : > { %1378 = vrot.lane.b32.xlu0 %v3604_v45, %s2925_s27  ;;  %1416 = vrot.lane.b32.xlu1 %v3594_v28, %s2926_s30 }
 0x28f   : > { %1418 = vrot.lane.b32.xlu0 %v3604_v45, %s2926_s30  ;;  %1464 = vrot.lane.b32.xlu1 %v3594_v28, %s2927_s11 }
 0x293   : > { %1466 = vrot.lane.b32.xlu0 %v3604_v45, %s2927_s11  ;;  %1292 = vrot.lane.b32.xlu1 %v3629_v63, %s2924_s19 }
 0x297   : > { %1332 = vrot.lane.b32.xlu1 %v3629_v63, %s2923_s16  ;;  %1294 = vrot.lane.b32.xlu0 %v3636_v32, %s2924_s19 }
 0x29b   : > { %1372 = vrot.lane.b32.xlu1 %v3629_v63, %s2925_s27  ;;  %1334 = vrot.lane.b32.xlu0 %v3636_v32, %s2923_s16 }
 0x29f   : > { %1412 = vrot.lane.b32.xlu1 %v3629_v63, %s2926_s30  ;;  %1374 = vrot.lane.b32.xlu0 %v3636_v32, %s2925_s27 }
 0x2a3   : > { %1300 = vrot.lane.b32.xlu1 %v3653_v47, %s2924_s19  ;;  %1414 = vrot.lane.b32.xlu0 %v3636_v32, %s2926_s30 }
 0x2a7   : > { %1460 = vrot.lane.b32.xlu1 %v3629_v63, %s2927_s11  ;;  %1302 = vrot.lane.b32.xlu0 %v3660_v5, %s2924_s19  ;;  %s4336_s19 = smov 112  }
 0x2ab   : > { %1340 = vrot.lane.b32.xlu1 %v3653_v47, %s2923_s16  ;;  %1462 = vrot.lane.b32.xlu0 %v3636_v32, %s2927_s11 }
 0x2af   : > { %1380 = vrot.lane.b32.xlu1 %v3653_v47, %s2925_s27  ;;  %1342 = vrot.lane.b32.xlu0 %v3660_v5, %s2923_s16 }
 0x2b3   : > { %1420 = vrot.lane.b32.xlu1 %v3653_v47, %s2926_s30  ;;  %1498 = vrot.lane.b32.xlu0 %v3561_v29, %s4335_s14 }
 0x2b7   : > { %1468 = vrot.lane.b32.xlu1 %v3653_v47, %s2927_s11  ;;  %1382 = vrot.lane.b32.xlu0 %v3660_v5, %s2925_s27  ;;  %s4337_s27 = smov 111  }
 0x2bb   : > { %1496 = vrot.lane.b32.xlu1 %v3548_v57, %s4335_s14  ;;  %1506 = vrot.lane.b32.xlu0 %v3604_v45, %s4335_s14 }
 0x2bf   : > { %1504 = vrot.lane.b32.xlu1 %v3594_v28, %s4335_s14  ;;  %1422 = vrot.lane.b32.xlu0 %v3660_v5, %s2926_s30 }
 0x2c3   : > { %1500 = vrot.lane.b32.xlu1 %v3629_v63, %s4335_s14  ;;  %1502 = vrot.lane.b32.xlu0 %v3636_v32, %s4335_s14 }
 0x2c7   : > { %1508 = vrot.lane.b32.xlu1 %v3653_v47, %s4335_s14  ;;  %1538 = vrot.lane.b32.xlu0 %v3561_v29, %s4336_s19 }
 0x2cb   : > { %1536 = vrot.lane.b32.xlu1 %v3548_v57, %s4336_s19  ;;  %1546 = vrot.lane.b32.xlu0 %v3604_v45, %s4336_s19 }
 0x2cf   : > { %1544 = vrot.lane.b32.xlu1 %v3594_v28, %s4336_s19  ;;  %1470 = vrot.lane.b32.xlu0 %v3660_v5, %s2927_s11  ;;  %s4347_s11 = sshll.u32 %s3193_s2, 7 }
 0x2d0   : > { %s4205_s15 = scalar_lea.vmem [#allocation13], %s4347_s11 }
 0x2d1   : > { %s2258_s24 = sshll.u32 %s4205_s15, 4  ;;  %s4228_s24 = int_to_ptr.vmem [resolvable:$true] %s2258_s24 }
 0x2d2   : > { %s2837_s13 = scalar_lea.vmem %s4228_s24, 2048 }
 0x2d3   : > { %1540 = vrot.lane.b32.xlu1 %v3629_v63, %s4336_s19  ;;  %1542 = vrot.lane.b32.xlu0 %v3636_v32, %s4336_s19  ;;  %p2838_p3 = scmp.ne.s32.totalorder %s4228_s24, %s2837_s13 }
 0x2d5   : > { %p2839_p7 = pnand %p2838_p3, %p3142_p5 }
 0x2d7   : > { %1548 = vrot.lane.b32.xlu1 %v3653_v47, %s4336_s19  ;;  %1510 = vrot.lane.b32.xlu0 %v3660_v5, %s4335_s14  ;;  %p2840_p12 = pneg %p2839_p7  ;;  %s2932_s14 = smov [#allocation13]  }
 0x2db   : > { %1576 = vrot.lane.b32.xlu1 %v3548_v57, %s4337_s27  ;;  %1578 = vrot.lane.b32.xlu0 %v3561_v29, %s4337_s27 }
 0x2dd   : > { %v1289_v49 = vpop.permute.xlu1 %1288 }
 0x2df   : > { %1584 = vrot.lane.b32.xlu1 %v3594_v28, %s4337_s27  ;;  %1550 = vrot.lane.b32.xlu0 %v3660_v5, %s4336_s19  ;;  %s2841_s19 = sshll.u32 %s2932_s14, 4  ;;  %s2842_s19 = int_to_ptr.vmem [resolvable:$false] %s2841_s19 }
 0x2e0   : > { %p2844_p1 = scmp.lt.s32.totalorder %s4228_s24, %s2842_s19 }
 0x2e1   : > { %v3725_v7 = vpop.permute.xlu1 %1328  ;;  %v1291_v14 = vpop.permute.xlu0 %1290 }
 0x2e3   : > { %1580 = vrot.lane.b32.xlu1 %v3629_v63, %s4337_s27  ;;  %1586 = vrot.lane.b32.xlu0 %v3604_v45, %s4337_s27 }
 0x2e5   : > { %v3731_v60 = vpop.permute.xlu1 %1368  ;;  %v3733_v58 = vpop.permute.xlu0 %1330 }
 0x2e7   : > { %1588 = vrot.lane.b32.xlu1 %v3653_v47, %s4337_s27  ;;  %1582 = vrot.lane.b32.xlu0 %v3636_v32, %s4337_s27 }
 0x2e9   : > { %v3739_v26 = vpop.permute.xlu1 %1408  ;;  %v3741_v6 = vpop.permute.xlu0 %1370 }
 0x2eb   : > { %1267 = vperm.xlu1 %2680, %v1264_v30   ;;  %1590 = vrot.lane.b32.xlu0 %v3660_v5, %s4337_s27  ;;  %s2843_s27 = scalar_lea.vmem %s2842_s19, 4096 }
 0x2ec   : > { %p2845_p2 = scmp.lt.s32.totalorder %s2843_s27, %s2837_s13 }
 0x2ed   : > { %v1457_v56 = vpop.permute.xlu1 %1456  ;;  %v3751_v1 = vpop.permute.xlu0 %1410 }
 0x2ee   : > { %p2846_p4 = por %p2845_p2, %p2844_p1 }
 0x2ef   : > { %1727 = vperm.xlu1 %2680, %v1713_v46   ;;  %1722 = vperm.xlu0 %2679, %v1712_v51  }
 0x2f0   : > { %p2847_p9 = pnand %p2846_p4, %p2840_p12 }
 0x2f1   : > { %v1297_v39 = vpop.permute.xlu1 %1296  ;;  %v1459_v52 = vpop.permute.xlu0 %1458 }
 0x2f2   : > { %v1304_v59 = vsel %vm602_vm2, %v1289_v49, %v1297_v39  ;;  %v1308_v8 = vsel %vm602_vm2, %v1297_v39, %v1289_v49  ;;  %v2044_v49 = vld [vmem:[%s4338_s25 + $0x10] sm:$0xff] }
 0x2f3   : > { %1737 = vperm.xlu1 %2680, %v1715_v31   ;;  %1732 = vperm.xlu0 %2679, %v1714_v16   ;;  %v1312_v24 = vmul.f32 %v1308_v8, %v3335_v43  ;;  %v1313_v10 = vmul.f32 %v1304_v59, %v3328_v42  ;;  %v2047_v16 = vld [vmem:[%s4338_s25 + $0x28] sm:$0xff] }
 0x2f5   : > { %v3766_v25 = vpop.permute.xlu1 %1336  ;;  %v1299_v36 = vpop.permute.xlu0 %1298 }
 0x2f6   : > { %v1305_v61 = vsel %vm602_vm2, %v1291_v14, %v1299_v36  ;;  %v1309_v54 = vsel %vm602_vm2, %v1299_v36, %v1291_v14 }
 0x2f7   : > { %v1314_v40 = vmul.f32 %v1309_v54, %v3335_v43  ;;  %v1315_v23 = vmul.f32 %v1305_v61, %v3328_v42  ;;  %1747 = vperm.xlu1 %2680, %v1717_v53   ;;  %1742 = vperm.xlu0 %2679, %v1716_v50   ;;  %v2046_v53 = vld [vmem:[%s4338_s25 + $0x20] sm:$0xff] }
 0x2f9   : > { %v2464_v27 = vpack.c.bf16 %v1314_v40, %v1312_v24  ;;  %v3782_v55 = vpop.permute.xlu1 %1376  ;;  %v1339_v48 = vpop.permute.xlu0 %1338  ;;  %v2462_v15 = vpack.c.bf16 %v1315_v23, %v1313_v10  ;;  %v2049_v10 = vld [vmem:[%s4338_s25 + $0x38] sm:$0xff] }
 0x2fb   : > { %1757 = vperm.xlu1 %2680, %v1719_v22   ;;  %1752 = vperm.xlu0 %2679, %v1718_v4   ;;  %v2048_v22 = vld [vmem:[%s4338_s25 + $0x30] sm:$0xff] }
 0x2fc   : > { %2463 = vmatprep.subr.bf16.mxu1 %v2462_v15 }
 0x2fd   : > { %2465 = vmatpush1.bf16.msra.mxu1 %v2464_v27  ;;  %v3790_v38 = vpop.permute.xlu1 %1416  ;;  %v3792_v13 = vpop.permute.xlu0 %1378 }
 0x2fe   : > { %v1428_v21 = vsel %vm659_vm4, %v3790_v38, %v3739_v26 }
 0x2ff   : > { %2057 = vperm.xlu1 %2680, %v2043_v20   ;;  %2052 = vperm.xlu0 %2679, %v2042_v18   ;;  %v3814_v30 = vmul.f32 %v1428_v21, %v3364_v2 }
 0x301   : > { %v1465_v19 = vpop.permute.xlu1 %1464  ;;  %v3804_v41 = vpop.permute.xlu0 %1418 }
 0x302   : > { %v1429_v14 = vsel %vm659_vm4, %v3804_v41, %v3751_v1  ;;  %v1472_v51 = vsel %vm680_vm5, %v1457_v56, %v1465_v19  ;;  %v1476_v31 = vsel %vm680_vm5, %v1465_v19, %v1457_v56 }
 0x303   : > { %v3817_v46 = vmul.f32 %v1429_v14, %v3364_v2  ;;  %2067 = vperm.xlu1 %2680, %v2045_v17   ;;  %2062 = vperm.xlu0 %2679, %v2044_v49   ;;  %v3836_v50 = vmul.f32 %v1472_v51, %v3379_v11  ;;  %v3839_v61 = vmul.f32 %v1476_v31, %v3382_v12 }
 0x304   : > { %v1345_v14 = vsel %vm621_vm1, %v3733_v58, %v1339_v48 }
 0x305   : > { %v1293_v59 = vpop.permute.xlu1 %1292  ;;  %v1467_v8 = vpop.permute.xlu0 %1466 }
 0x306   : > { %v1473_v36 = vsel %vm680_vm5, %v1459_v52, %v1467_v8  ;;  %v1477_v56 = vsel %vm680_vm5, %v1467_v8, %v1459_v52 }
 0x307   : > { %v3842_v54 = vmul.f32 %v1473_v36, %v3379_v11  ;;  %v3845_v24 = vmul.f32 %v1477_v56, %v3382_v12  ;;  %2077 = vperm.xlu1 %2680, %v2047_v16   ;;  %2072 = vperm.xlu0 %2679, %v2046_v53   ;;  %v1344_v16 = vsel %vm621_vm1, %v3725_v7, %v3766_v25 }
 0x308   : > { %v1349_v36 = vsel %vm621_vm1, %v1339_v48, %v3733_v58  ;;  %v1355_v56 = vmul.f32 %v1345_v14, %v3331_v9  ;;  %v1348_v58 = vsel %vm621_vm1, %v3766_v25, %v3725_v7  ;;  %v1353_v48 = vmul.f32 %v1344_v16, %v3331_v9 }
 0x309   : > { %v1333_v40 = vpop.permute.xlu1 %1332  ;;  %v1295_v23 = vpop.permute.xlu0 %1294  ;;  %v1354_v14 = vmul.f32 %v1349_v36, %v3338_v44  ;;  %v1389_v36 = vsel %vm640_vm3, %v3792_v13, %v3741_v6 }
 0x30b   : > { %2087 = vperm.xlu1 %2680, %v2049_v10   ;;  %2082 = vperm.xlu0 %2679, %v2048_v22  }
 0x30d   : > { %v3857_v4 = vpop.permute.xlu1 %1372  ;;  %v1335_v15 = vpop.permute.xlu0 %1334 }
 0x311   : > { %v3859_v20 = vpop.permute.xlu1 %1412  ;;  %v3861_v18 = vpop.permute.xlu0 %1374 }
 0x313   : > { %v3863_v21 = vpop.f32.mrb[0].mxu1 }
 0x314   : > { %v3865_v17 = vpop.f32.mrb[1].mxu1 }
 0x315   : > { %4339 = vst [vmem:[#allocation22_spill] sm:$0xff] %v3865_v17  ;;  %v1301_v19 = vpop.permute.xlu1 %1300  ;;  %v3867_v49 = vpop.permute.xlu0 %1414 }
 0x316   : > { %v1306_v51 = vsel %vm602_vm2, %v1293_v59, %v1301_v19  ;;  %v1310_v31 = vsel %vm602_vm2, %v1301_v19, %v1293_v59 }
 0x317   : > { %v1316_v22 = vmul.f32 %v1310_v31, %v3335_v43  ;;  %v1317_v19 = vmul.f32 %v1306_v51, %v3328_v42  ;;  %v1352_v51 = vmul.f32 %v1348_v58, %v3338_v44 }
 0x319   : > { %v3880_v8 = vpop.permute.xlu1 %1460  ;;  %v1303_v53 = vpop.permute.xlu0 %1302 }
 0x31a   : > { %v1307_v10 = vsel %vm602_vm2, %v1295_v23, %v1303_v53  ;;  %v1311_v59 = vsel %vm602_vm2, %v1303_v53, %v1295_v23 }
 0x31b   : > { %v1318_v52 = vmul.f32 %v1311_v59, %v3335_v43  ;;  %v1319_v27 = vmul.f32 %v1307_v10, %v3328_v42  ;;  %v1385_v42 = vsel %vm640_vm3, %v3741_v6, %v3792_v13  ;;  %v2470_v43 = vpack.c.bf16 %v1355_v56, %v1353_v48 }
 0x31c   : > { %v1395_v56 = vmul.f32 %v1385_v42, %v3360_v0  ;;  %v1388_v6 = vsel %vm640_vm3, %v3782_v55, %v3731_v60 }
 0x31d   : > { %v2468_v39 = vpack.c.bf16 %v1318_v52, %v1316_v22  ;;  %v1341_v17 = vpop.permute.xlu1 %1340  ;;  %v3900_v23 = vpop.permute.xlu0 %1462  ;;  %v2466_v31 = vpack.c.bf16 %v1319_v27, %v1317_v19  ;;  %v1384_v52 = vsel %vm640_vm3, %v3731_v60, %v3782_v55  ;;  %v2472_v27 = vpack.c.bf16 %v1354_v14, %v1352_v51 }
 0x31e   : > { %v1346_v7 = vsel %vm621_vm1, %v1333_v40, %v1341_v17  ;;  %v1350_v25 = vsel %vm621_vm1, %v1341_v17, %v1333_v40  ;;  %v1393_v13 = vmul.f32 %v1384_v52, %v3360_v0  ;;  %v1394_v14 = vmul.f32 %v1389_v36, %v3356_v62 }
 0x31f   : > { %2467 = vmatprep.subr.bf16.mxu1 %v2466_v31  ;;  %v1356_v17 = vmul.f32 %v1350_v25, %v3338_v44  ;;  %v1357_v10 = vmul.f32 %v1346_v7, %v3331_v9  ;;  %v1392_v31 = vmul.f32 %v1388_v6, %v3356_v62  ;;  %v1424_v51 = vsel %vm659_vm4, %v3739_v26, %v3790_v38 }
 0x320   : > { %2469 = vmatpush1.bf16.msra.mxu1 %v2468_v39 }
 0x321   : > { %v1381_v16 = vpop.permute.xlu1 %1380  ;;  %2471 = vmatprep.subr.bf16.mxu1 %v2470_v43  ;;  %v1343_v53 = vpop.permute.xlu0 %1342 }
 0x322   : > { %v1347_v40 = vsel %vm621_vm1, %v1335_v15, %v1343_v53  ;;  %v1351_v39 = vsel %vm621_vm1, %v1343_v53, %v1335_v15  ;;  %v1386_v60 = vsel %vm640_vm3, %v3857_v4, %v1381_v16  ;;  %v1390_v55 = vsel %vm640_vm3, %v1381_v16, %v3857_v4 }
 0x323   : > { %v1358_v59 = vmul.f32 %v1351_v39, %v3338_v44  ;;  %v1359_v22 = vmul.f32 %v1347_v40, %v3331_v9  ;;  %v1425_v9 = vsel %vm659_vm4, %v3751_v1, %v3804_v41  ;;  %v2478_v44 = vpack.c.bf16 %v1395_v56, %v1393_v13 }
 0x324   : > { %2473 = vmatpush1.bf16.msra.mxu1 %v2472_v27  ;;  %v2480_v41 = vpack.c.bf16 %v1394_v14, %v1392_v31  ;;  %v1435_v43 = vmul.f32 %v1425_v9, %v3367_v3  ;;  %v1396_v25 = vmul.f32 %v1390_v55, %v3356_v62  ;;  %v1397_v52 = vmul.f32 %v1386_v60, %v3360_v0 }
 0x325   : > { %v2476_v19 = vpack.c.bf16 %v1358_v59, %v1356_v17  ;;  %v1421_v58 = vpop.permute.xlu1 %1420  ;;  %v3933_v48 = vpop.permute.xlu0 %1498  ;;  %v2474_v15 = vpack.c.bf16 %v1359_v22, %v1357_v10  ;;  %v1433_v27 = vmul.f32 %v1424_v51, %v3367_v3  ;;  %v4340_v13 = vpack.c.bf16 %v3817_v46, %v3814_v30 }
 0x326   : > { %v1430_v39 = vsel %vm659_vm4, %v1421_v58, %v3859_v20  ;;  %vm2090_vm1 = vcmask 523264  }
 0x327   : > { %2475 = vmatprep.subr.bf16.mxu1 %v2474_v15  ;;  %v2486_v40 = vpack.c.bf16 %v1435_v43, %v1433_v27  ;;  %v1436_v59 = vmul.f32 %v1430_v39, %v3364_v2 }
 0x328   : > { %2477 = vmatpush1.bf16.msra.mxu1 %v2476_v19 }
 0x329   : > { %v1469_v42 = vpop.permute.xlu1 %1468  ;;  %2479 = vmatprep.subr.bf16.mxu1 %v2478_v44  ;;  %v1383_v1 = vpop.permute.xlu0 %1382 }
 0x32a   : > { %v1387_v7 = vsel %vm640_vm3, %v3861_v18, %v1383_v1  ;;  %v1391_v4 = vsel %vm640_vm3, %v1383_v1, %v3861_v18  ;;  %v1426_v18 = vsel %vm659_vm4, %v3859_v20, %v1421_v58  ;;  %v1474_v31 = vsel %vm680_vm5, %v3880_v8, %v1469_v42 }
 0x32b   : > { %v1398_v26 = vmul.f32 %v1391_v4, %v3356_v62  ;;  %v1399_v38 = vmul.f32 %v1387_v7, %v3360_v0  ;;  %v1437_v22 = vmul.f32 %v1426_v18, %v3367_v3 }
 0x32c   : > { %2481 = vmatpush1.bf16.msra.mxu1 %v2480_v41  ;;  %v4342_v41 = vpack.c.bf16 %v3842_v54, %v3836_v50 }
 0x32d   : > { %v2484_v16 = vpack.c.bf16 %v1398_v26, %v1396_v25  ;;  %v1497_v53 = vpop.permute.xlu1 %1496  ;;  %v1507_v36 = vpop.permute.xlu0 %1506  ;;  %v2482_v56 = vpack.c.bf16 %v1399_v38, %v1397_v52 }
 0x32e   : > { %v1513_v1 = vsel %vm699_vm6, %v3933_v48, %v1507_v36 }
 0x32f   : > { %2483 = vmatprep.subr.bf16.mxu1 %v2482_v56 }
 0x330   : > { %2485 = vmatpush1.bf16.msra.mxu1 %v2484_v16 }
 0x331   : > { %v1505_v62 = vpop.permute.xlu1 %1504  ;;  %2487 = vmatprep.subr.bf16.mxu1 %v2486_v40  ;;  %v1423_v0 = vpop.permute.xlu0 %1422 }
 0x332   : > { %v1427_v17 = vsel %vm659_vm4, %v3867_v49, %v1423_v0  ;;  %v1431_v10 = vsel %vm659_vm4, %v1423_v0, %v3867_v49  ;;  %v2494_v49 = vpack.c.bf16 %v3604_v45, %v3594_v28  ;;  %v2500_v28 = vpack.c.bf16 %v3636_v32, %v3629_v63 }
 0x333   : > { %v1438_v6 = vmul.f32 %v1431_v10, %v3364_v2  ;;  %v1439_v20 = vmul.f32 %v1427_v17, %v3367_v3  ;;  %v2496_v2 = vpack.c.bf16 %v3561_v29, %v3548_v57  ;;  %v2498_v3 = vpack.c.bf16 %v3660_v5, %v3653_v47 }
 0x334   : > { %2489 = vmatpush1.bf16.msra.mxu1 %v4340_v13  ;;  %v1478_v45 = vsel %vm680_vm5, %v1469_v42, %v3880_v8  ;;  %v1516_v57 = vsel %vm699_vm6, %v1505_v62, %v1497_v53  ;;  %v1484_v29 = vmul.f32 %v1474_v31, %v3379_v11  ;;  %v4341_v5 = vpack.c.bf16 %v3845_v24, %v3839_v61  ;;  %v4343_v13 = vld [vmem:[#allocation21_spill] sm:$0xff] }
 0x335   : > { %v2492_v19 = vpack.c.bf16 %v1438_v6, %v1436_v59  ;;  %v1501_v58 = vpop.permute.xlu1 %1500  ;;  %v1503_v15 = vpop.permute.xlu0 %1502  ;;  %v2490_v14 = vpack.c.bf16 %v1439_v20, %v1437_v22  ;;  %v1517_v63 = vsel %vm699_vm6, %v1507_v36, %v3933_v48  ;;  %v1512_v32 = vsel %vm699_vm6, %v1497_v53, %v1505_v62 }
 0x336   : > { %v1485_v51 = vmul.f32 %v1478_v45, %v3382_v12  ;;  %v1521_v61 = vmul.f32 %v1516_v57, %v3403_v34  ;;  %v1523_v43 = vmul.f32 %v1517_v63, %v3403_v34 }
 0x337   : > { %2491 = vmatprep.subr.bf16.mxu1 %v2490_v14 }
 0x338   : > { %2493 = vmatpush1.bf16.msra.mxu1 %v2492_v19  ;;  %v2510_v26 = vpack.c.bf16 %v1523_v43, %v1521_v61 }
 0x339   : > { %v1509_v9 = vpop.permute.xlu1 %1508  ;;  %2495 = vmatprep.subr.bf16.mxu1 %v2494_v49  ;;  %v1539_v44 = vpop.permute.xlu0 %1538 }
 0x33a   : > { %v1518_v48 = vsel %vm699_vm6, %v1509_v9, %v1501_v58 }
 0x33b   : > { %v1525_v53 = vmul.f32 %v1518_v48, %v3403_v34 }
 0x33c   : > { %2497 = vmatpush1.bf16.msra.mxu1 %v2496_v2 }
 0x33d   : > { %v1537_v30 = vpop.permute.xlu1 %1536  ;;  %2499 = vmatprep.subr.bf16.mxu1 %v2498_v3  ;;  %v1547_v46 = vpop.permute.xlu0 %1546 }
 0x33e   : > { %v1557_v36 = vsel %vm718_vm7, %v1547_v46, %v1539_v44  ;;  %v1553_v17 = vsel %vm718_vm7, %v1539_v44, %v1547_v46 }
 0x33f   : > { %v1563_v10 = vmul.f32 %v1557_v36, %v3410_v37  ;;  %v1626_v36 = vld [vmem:[%s4282_s7 + $0x50] sm:$0xff] }
 0x340   : > { %2501 = vmatpush1.bf16.msra.mxu1 %v2500_v28 }
 0x341   : > { %v1545_v47 = vpop.permute.xlu1 %1544  ;;  %2503 = vmatprep.subr.bf16.mxu1 %v4341_v5  ;;  %v1471_v60 = vpop.permute.xlu0 %1470 }
 0x342   : > { %v1475_v8 = vsel %vm680_vm5, %v3900_v23, %v1471_v60  ;;  %v1479_v55 = vsel %vm680_vm5, %v1471_v60, %v3900_v23  ;;  %v1520_v23 = vmul.f32 %v1512_v32, %v3400_v33  ;;  %v1556_v50 = vsel %vm718_vm7, %v1545_v47, %v1537_v30  ;;  %v2721_v32 = vld [vmem:[#allocation8 + $0x10] ss:$0 sm:$0xff] }
 0x343   : > { %v1486_v24 = vmul.f32 %v1475_v8, %v3379_v11  ;;  %v1487_v42 = vmul.f32 %v1479_v55, %v3382_v12  ;;  %v1514_v11 = vsel %vm699_vm6, %v1501_v58, %v1509_v9  ;;  %v1522_v12 = vmul.f32 %v1513_v1, %v3400_v33 }
 0x344   : > { %2505 = vmatpush1.bf16.msra.mxu1 %v4342_v41  ;;  %v1524_v38 = vmul.f32 %v1514_v11, %v3400_v33  ;;  %v1552_v18 = vsel %vm718_vm7, %v1537_v30, %v1545_v47  ;;  %v1561_v39 = vmul.f32 %v1556_v50, %v3410_v37  ;;  %v1623_v11 = vld [vmem:[%s4282_s7 + $0x38] sm:$0xff] }
 0x345   : > { %v2508_v7 = vpack.c.bf16 %v1486_v24, %v1484_v29  ;;  %v1541_v4 = vpop.permute.xlu1 %1540  ;;  %v1543_v25 = vpop.permute.xlu0 %1542  ;;  %v2506_v52 = vpack.c.bf16 %v1487_v42, %v1485_v51  ;;  %v2512_v54 = vpack.c.bf16 %v1522_v12, %v1520_v23  ;;  %v1560_v19 = vmul.f32 %v1552_v18, %v4343_v13  ;;  %v1616_v24 = vld [vmem:[%s4282_s7] sm:$0xff] }
 0x346   : > { %v2518_v58 = vpack.c.bf16 %v1563_v10, %v1561_v39  ;;  %v1620_v23 = vld [vmem:[%s4282_s7 + $0x20] sm:$0xff]  ;;  %v4344_v18 = vmov 0.0  }
 0x347   : > { %2507 = vmatprep.subr.bf16.mxu1 %v2506_v52  ;;  %v1628_v39 = vld [vmem:[%s4282_s7 + $0x60] sm:$0xff] }
 0x348   : > { %2509 = vmatpush1.bf16.msra.mxu1 %v2508_v7  ;;  %v1624_v10 = vld [vmem:[%s4282_s7 + $0x40] sm:$0xff] }
 0x349   : > { %v1549_v27 = vpop.permute.xlu1 %1548  ;;  %2511 = vmatprep.subr.bf16.mxu1 %v2510_v26  ;;  %v1511_v16 = vpop.permute.xlu0 %1510 }
 0x34a   : > { %v1515_v56 = vsel %vm699_vm6, %v1503_v15, %v1511_v16  ;;  %v1519_v40 = vsel %vm699_vm6, %v1511_v16, %v1503_v15  ;;  %v1562_v15 = vmul.f32 %v1553_v17, %v4343_v13  ;;  %v1631_v17 = vld [vmem:[%s4282_s7 + $0x78] sm:$0xff] }
 0x34b   : > { %v1526_v62 = vmul.f32 %v1515_v56, %v3400_v33  ;;  %v1527_v0 = vmul.f32 %v1519_v40, %v3403_v34  ;;  %v1554_v33 = vsel %vm718_vm7, %v1541_v4, %v1549_v27  ;;  %v1558_v34 = vsel %vm718_vm7, %v1549_v27, %v1541_v4  ;;  %v1622_v27 = vld [vmem:[%s4282_s7 + $0x30] sm:$0xff]  ;;  %v1629_v40 = vld [vmem:[%s4282_s7 + $0x68] sm:$0xff] }
 0x34c   : > { %2513 = vmatpush1.bf16.msra.mxu1 %v2512_v54  ;;  %v2520_v9 = vpack.c.bf16 %v1562_v15, %v1560_v19  ;;  %v1564_v3 = vmul.f32 %v1554_v33, %v4343_v13  ;;  %v1565_v30 = vmul.f32 %v1558_v34, %v3410_v37  ;;  %v1618_v56 = vld [vmem:[%s4282_s7 + $0x10] sm:$0xff]  ;;  %v1636_v15 = vld [vmem:[%s4282_s7 + $0xa0] sm:$0xff]  ;;  %v1639_v33 = vld [vmem:[%s4282_s7 + $0xb8] sm:$0xff] }
 0x34d   : > { %v2516_v59 = vpack.c.bf16 %v1526_v62, %v1524_v38  ;;  %v1577_v22 = vpop.permute.xlu1 %1576  ;;  %v1579_v6 = vpop.permute.xlu0 %1578  ;;  %v2514_v20 = vpack.c.bf16 %v1527_v0, %v1525_v53  ;;  %v1621_v62 = vld [vmem:[%s4282_s7 + $0x28] sm:$0xff]  ;;  %v1632_v0 = vld [vmem:[%s4282_s7 + $0x80] sm:$0xff]  ;;  %v1630_v19 = vld [vmem:[%s4282_s7 + $0x70] sm:$0xff] }
 0x34f   : > { %2515 = vmatprep.subr.bf16.mxu1 %v2514_v20  ;;  %v1638_v20 = vld [vmem:[%s4282_s7 + $0xb0] sm:$0xff] }
 0x350   : > { %2517 = vmatpush1.bf16.msra.mxu1 %v2516_v59  ;;  %v1635_v59 = vld [vmem:[%s4282_s7 + $0x98] sm:$0xff] }
 0x351   : > { %v1585_v14 = vpop.permute.xlu1 %1584  ;;  %2519 = vmatprep.subr.bf16.mxu1 %v2518_v58  ;;  %v1551_v49 = vpop.permute.xlu0 %1550  ;;  %v1633_v58 = vld [vmem:[%s4282_s7 + $0x88] sm:$0xff] }
 0x352   : > { %v1555_v44 = vsel %vm718_vm7, %v1543_v25, %v1551_v49  ;;  %v1559_v2 = vsel %vm718_vm7, %v1551_v49, %v1543_v25  ;;  %v1592_v28 = vsel %vm737_vm8, %v1577_v22, %v1585_v14  ;;  %v1596_v45 = vsel %vm737_vm8, %v1585_v14, %v1577_v22  ;;  %v1619_v25 = vld [vmem:[%s4282_s7 + $0x18] sm:$0xff]  ;;  %v1634_v22 = vld [vmem:[%s4282_s7 + $0x90] sm:$0xff] }
 0x353   : > { %v1566_v46 = vmul.f32 %v1555_v44, %v4343_v13  ;;  %v1567_v31 = vmul.f32 %v1559_v2, %v3410_v37  ;;  %v1600_v8 = vmul.f32 %v2721_v32, %v1592_v28  ;;  %v2722_v37 = vld [vmem:[#allocation8 + $0x18] ss:$0 sm:$0xff]  ;;  %v4345_v14 = vld [vmem:[#allocation20_spill] sm:$0xff]  ;;  %v4346_v44 = vld [vmem:[#allocation22_spill] sm:$0xff] }
 0x354   : > { %2521 = vmatpush1.bf16.msra.mxu1 %v2520_v9  ;;  %v1601_v55 = vmul.f32 %v2722_v37, %v1596_v45  ;;  %v1637_v13 = vld [vmem:[%s4282_s7 + $0xa8] sm:$0xff] }
 0x355   : > { %v2524_v57 = vpack.c.bf16 %v1566_v46, %v1564_v3  ;;  %v1581_v29 = vpop.permute.xlu1 %1580  ;;  %v1587_v47 = vpop.permute.xlu0 %1586  ;;  %v2522_v5 = vpack.c.bf16 %v1567_v31, %v1565_v30 }
 0x356   : > { %v1593_v60 = vsel %vm737_vm8, %v1579_v6, %v1587_v47  ;;  %v1597_v63 = vsel %vm737_vm8, %v1587_v47, %v1579_v6  ;;  %v1627_v6 = vld [vmem:[%s4282_s7 + $0x58] sm:$0xff] }
 0x357   : > { %v1602_v51 = vmul.f32 %v2721_v32, %v1593_v60  ;;  %v1603_v61 = vmul.f32 %v2722_v37, %v1597_v63  ;;  %2523 = vmatprep.subr.bf16.mxu1 %v2522_v5 }
 0x358   : > { %2525 = vmatpush1.bf16.msra.mxu1 %v2524_v57 }
 0x359   : > { %v2528_v42 = vpack.c.bf16 %v1602_v51, %v1600_v8  ;;  %v1589_v1 = vpop.permute.xlu1 %1588  ;;  %v1583_v41 = vpop.permute.xlu0 %1582  ;;  %v2526_v43 = vpack.c.bf16 %v1603_v61, %v1601_v55 }
 0x35a   : > { %v1594_v7 = vsel %vm737_vm8, %v1581_v29, %v1589_v1  ;;  %v1598_v4 = vsel %vm737_vm8, %v1589_v1, %v1581_v29 }
 0x35b   : > { %1849 = vmatmul.mubr.f32.vlgmr.msra.gmra.mrb[2].mxu1 %v1616_v24  ;;  %2527 = vmatprep.subr.bf16.mxu0 %v2526_v43  ;;  %v1604_v26 = vmul.f32 %v2721_v32, %v1594_v7  ;;  %v1605_v50 = vmul.f32 %v2722_v37, %v1598_v4 }
 0x35c   : > { %2550 = vmatprep.subr.bf16.mxu1 %v2526_v43  ;;  %2529 = vmatpush1.bf16.msra.mxu0 %v2528_v42 }
 0x35d   : > { %2552 = vmatpush1.bf16.msra.mxu1 %v2528_v42  ;;  %v1591_v52 = vpop.permute.xlu0 %1590  ;;  %1854 = vmatprep.mubr.f32.mxu1 %v1620_v23 }
 0x35e   : > { %v1595_v12 = vsel %vm737_vm8, %v1583_v41, %v1591_v52  ;;  %v1599_v48 = vsel %vm737_vm8, %v1591_v52, %v1583_v41 }
 0x35f   : > { %v1606_v54 = vmul.f32 %v2721_v32, %v1595_v12  ;;  %v1607_v38 = vmul.f32 %v2722_v37, %v1599_v48  ;;  %1855 = vmatmul.mubr.f32.gmra.mrb[4].mxu1 %v1619_v25 }
 0x360   : > { %1860 = vmatprep.mubr.f32.mxu1 %v1623_v11 }
 0x361   : > { %v2532_v16 = vpack.c.bf16 %v1606_v54, %v1604_v26  ;;  %v2530_v53 = vpack.c.bf16 %v1607_v38, %v1605_v50 }
 0x363   : > { %1861 = vmatmul.mubr.f32.gmra.mrb[6].mxu1 %v1622_v27  ;;  %2531 = vmatprep.subr.bf16.mxu0 %v2530_v53 }
 0x364   : > { %2551 = vmatprep.subr.bf16.mxu1 %v2530_v53  ;;  %2533 = vmatpush1.bf16.msra.mxu0 %v2532_v16 }
 0x365   : > { %2553 = vmatpush1.bf16.msra.mxu1 %v2532_v16  ;;  %1866 = vmatprep.mubr.f32.mxu1 %v1626_v36 }
 0x367   : > { %1867 = vmatmul.mubr.f32.gmra.mrb[8].mxu1 %v1625_v35  ;;  %2415 = vmatmul.mubr.msk.f32.vlgmr.msra.gmra.mrb[16].mxu0 %vm1189_vm10, %v1618_v56 }
 0x368   : > { %1872 = vmatprep.mubr.f32.mxu1 %v1629_v40  ;;  %1967 = vmatprep.mubr.f32.mxu0 %v4344_v18 }
 0x36a   : > { %v1268_v34 = vpop.permute.xlu1 %1267 }
 0x36b   : > { %1873 = vmatmul.mubr.f32.gmra.mrb[10].mxu1 %v1628_v39  ;;  %2416 = vmatmul.mubr.msk.f32.gmra.mrb[18].mxu0 %vm1189_vm10, %v1621_v62  ;;  %v1273_v49 = vrot.slane %v1268_v34, %v4345_v14 }
 0x36c   : > { %1878 = vmatprep.mubr.f32.mxu1 %v1632_v0  ;;  %1973 = vmatprep.mubr.f32.mxu0 %v4344_v18 }
 0x36d   : > { %v1274_v9 = vadd.f32 %v1273_v49, %v3863_v21  ;;  %v1275_v2 = vadd.f32 %v1273_v49, %v4346_v44 }
 0x36e   : > { %v1723_v37 = vpop.permute.xlu0 %1722  ;;  %v1728_v4 = vpop.permute.xlu1 %1727 }
 0x36f   : > { %1879 = vmatmul.mubr.f32.gmra.mrb[12].mxu1 %v1631_v17  ;;  %2417 = vmatmul.mubr.msk.f32.gmra.mrb[20].mxu0 %vm1189_vm10, %v1624_v10  ;;  %v1276_v3 = vsub.f32 0.0, %v1274_v9  ;;  %v1277_v30 = vsub.f32 0.0, %v1275_v2 }
 0x370   : > { %1884 = vmatprep.mubr.f32.mxu1 %v1635_v59  ;;  %1979 = vmatprep.mubr.f32.mxu0 %v4344_v18 }
 0x371   : > { %v1278_v46 = vmul.f32 1.442695, %v1276_v3  ;;  %v1280_v31 = vmul.f32 1.442695, %v1277_v30 }
 0x372   : > { %v1733_v16 = vpop.permute.xlu0 %1732 }
 0x373   : > { %1885 = vmatmul.mubr.f32.gmra.mrb[14].mxu1 %v1634_v22  ;;  %2418 = vmatmul.mubr.msk.f32.gmra.mrb[22].mxu0 %vm1189_vm10, %v1627_v6  ;;  %2713 = vpow2.f32 %v1278_v46  ;;  %v1738_v22 = vpop.permute.xlu1 %1737 }
 0x374   : > { %1890 = vmatprep.mubr.f32.mxu1 %v1638_v20  ;;  %1985 = vmatprep.mubr.f32.mxu0 %v4344_v18  ;;  %2715 = vpow2.f32 %v1280_v31 }
 0x376   : > { %v1743_v44 = vpop.permute.xlu0 %1742 }
 0x377   : > { %1891 = vmatmul.mubr.f32.gmra.mrb[16].mxu1 %v1637_v13  ;;  %2419 = vmatmul.mubr.msk.f32.gmra.mrb[24].mxu0 %vm1189_vm10, %v1630_v19 }
 0x378   : > { %1991 = vmatprep.mubr.f32.mxu0 %v4344_v18  ;;  %2003 = vmatprep.mubr.f32.mxu1 %v4344_v18 }
 0x37b   : > { %2420 = vmatmul.mubr.msk.f32.gmra.mrb[26].mxu0 %vm1189_vm10, %v1633_v58 }
 0x37c   : > { %1997 = vmatprep.mubr.f32.mxu0 %v4344_v18 }
 0x37d   : > { %v2714_v28 = vpop.eup %2713 }
 0x37e   : > { %v2716_v45 = vpop.eup %2715  ;;  %v1282_v57 = vadd.f32 1.0, %v2714_v28 }
 0x37f   : > { %2421 = vmatmul.mubr.msk.f32.gmra.mrb[28].mxu0 %vm1189_vm10, %v1636_v15  ;;  %2422 = vmatmul.mubr.msk.f32.vlgmr.msra.gmra.mrb[16].mxu1 %vm1189_vm10, %v1639_v33  ;;  %v1283_v29 = vadd.f32 1.0, %v2716_v45  ;;  %v1748_v45 = vpop.permute.xlu1 %1747 }
 0x380   : > { %2179 = vmatprep.mubr.f32.mxu0 %v4344_v18  ;;  %2717 = vrcp.f32 %v1282_v57 }
 0x381   : > { %2719 = vrcp.f32 %v1283_v29 }
 0x38a   : > { %v2718_v8 = vpop.eup %2717 }
 0x38b   : > { %v2720_v55 = vpop.eup %2719  ;;  %v4167_v1 = vrot.slane %v2718_v8, %v4345_v14 }
 0x38c   : > { %v4170_v7 = vrot.slane %v2720_v55, %v4345_v14 }
 0x42e   : > { %v1850_v47 = vpop.f32.mrb[2].mxu1 }
 0x42f   : > { %v1852_v5 = vpop.f32.mrb[3].mxu1  ;;  %v1851_v51 = vadd.f32 %v1850_v47, %v1723_v37 }
 0x430   : > { %v1853_v61 = vadd.f32 %v1852_v5, %v1723_v37 }
 0x432   : > { %v1856_v60 = vpop.f32.mrb[4].mxu1 }
 0x433   : > { %v1858_v63 = vpop.f32.mrb[5].mxu1  ;;  %v1857_v52 = vadd.f32 %v1856_v60, %v1728_v4 }
 0x434   : > { %v1859_v12 = vadd.f32 %v1858_v63, %v1728_v4 }
 0x436   : > { %v1862_v32 = vpop.f32.mrb[6].mxu1 }
 0x437   : > { %v1864_v21 = vpop.f32.mrb[7].mxu1  ;;  %v1863_v36 = vadd.f32 %v1862_v32, %v1733_v16 }
 0x438   : > { %v1865_v56 = vadd.f32 %v1864_v21, %v1733_v16 }
 0x43a   : > { %v1868_v24 = vpop.f32.mrb[8].mxu1  ;;  %v1963_v42 = vpop.f32.mrb[16].mxu0 }
 0x43b   : > { %v1964_v41 = vadd.f32 %v1963_v42, %v1851_v51  ;;  %v1870_v43 = vpop.f32.mrb[9].mxu1  ;;  %v1965_v23 = vpop.f32.mrb[17].mxu0  ;;  %v1869_v13 = vadd.f32 %v1868_v24, %v1738_v22 }
 0x43c   : > { %v1966_v25 = vadd.f32 %v1965_v23, %v1853_v61  ;;  %v1871_v58 = vadd.f32 %v1870_v43, %v1738_v22  ;;  %v1753_v61 = vpop.permute.xlu0 %1752  ;;  %v1758_v42 = vpop.permute.xlu1 %1757 }
 0x43d   : > { %v2018_v11 = vmul.f32 %v4167_v1, %v1964_v41 }
 0x43e   : > { %v2019_v48 = vmul.f32 %v4170_v7, %v1966_v25  ;;  %v1874_v26 = vpop.f32.mrb[10].mxu1  ;;  %v1969_v50 = vpop.f32.mrb[18].mxu0 }
 0x43f   : > { %v1970_v54 = vadd.f32 %v1969_v50, %v1857_v52  ;;  %v1876_v38 = vpop.f32.mrb[11].mxu1  ;;  %v1971_v27 = vpop.f32.mrb[19].mxu0  ;;  %v1875_v3 = vadd.f32 %v1874_v26, %v1743_v44 }
 0x440   : > { %v1972_v53 = vadd.f32 %v1971_v27, %v1859_v12  ;;  %v1877_v46 = vadd.f32 %v1876_v38, %v1743_v44  ;;  %v2053_v22 = vpop.permute.xlu0 %2052 }
 0x441   : > { %v2020_v35 = vmul.f32 %v4167_v1, %v1970_v54 }
 0x442   : > { %v2021_v40 = vmul.f32 %v4170_v7, %v1972_v53  ;;  %v1880_v39 = vpop.f32.mrb[12].mxu1  ;;  %v1975_v62 = vpop.f32.mrb[20].mxu0 }
 0x443   : > { %v2536_v0 = vpack.c.bf16 %v2020_v35, %v2018_v11  ;;  %v1976_v17 = vadd.f32 %v1975_v62, %v1863_v36  ;;  %v1882_v10 = vpop.f32.mrb[13].mxu1  ;;  %v1977_v59 = vpop.f32.mrb[21].mxu0  ;;  %v1881_v63 = vadd.f32 %v1880_v39, %v1748_v45  ;;  %v2034_v39 = vld [vmem:[#allocation11] sm:$0xff]  ;;  %v2035_v62 = vld [vmem:[#allocation11 + $0x8] sm:$0xff] }
 0x444   : > { %v1978_v6 = vadd.f32 %v1977_v59, %v1865_v56  ;;  %v2534_v20 = vpack.c.bf16 %v2021_v40, %v2019_v48  ;;  %v1883_v21 = vadd.f32 %v1882_v10, %v1748_v45  ;;  %v2040_v10 = vld [vmem:[#allocation11 + $0x30] sm:$0xff]  ;;  %v2041_v59 = vld [vmem:[#allocation11 + $0x38] sm:$0xff] }
 0x445   : > { %v2022_v19 = vmul.f32 %v4167_v1, %v1976_v17  ;;  %v2039_v17 = vld [vmem:[#allocation11 + $0x28] sm:$0xff] }
 0x446   : > { %v2023_v15 = vmul.f32 %v4170_v7, %v1978_v6  ;;  %v1886_v33 = vpop.f32.mrb[14].mxu1  ;;  %v1981_v34 = vpop.f32.mrb[22].mxu0  ;;  %2535 = vmatprep.subr.bf16.mxu0 %v2534_v20 }
 0x447   : > { %v1982_v14 = vadd.f32 %v1981_v34, %v1869_v13  ;;  %v1888_v49 = vpop.f32.mrb[15].mxu1  ;;  %v1983_v9 = vpop.f32.mrb[23].mxu0  ;;  %2537 = vmatpush1.bf16.msra.mxu0 %v2536_v0  ;;  %v1887_v41 = vadd.f32 %v1886_v33, %v1753_v61  ;;  %v2038_v0 = vld [vmem:[#allocation11 + $0x20] sm:$0xff] }
 0x448   : > { %v1984_v2 = vadd.f32 %v1983_v9, %v1871_v58  ;;  %v1889_v23 = vadd.f32 %v1888_v49, %v1753_v61  ;;  %v2058_v58 = vpop.permute.xlu1 %2057 }
 0x449   : > { %v2024_v30 = vmul.f32 %v4167_v1, %v1982_v14  ;;  %v2063_v14 = vpop.permute.xlu0 %2062 }
 0x44a   : > { %v2025_v31 = vmul.f32 %v4170_v7, %v1984_v2  ;;  %v1987_v28 = vpop.f32.mrb[24].mxu0 }
 0x44b   : > { %v2540_v57 = vpack.c.bf16 %v2024_v30, %v2022_v19  ;;  %v1988_v29 = vadd.f32 %v1987_v28, %v1875_v3  ;;  %v1989_v47 = vpop.f32.mrb[25].mxu0 }
 0x44c   : > { %v1990_v5 = vadd.f32 %v1989_v47, %v1877_v46  ;;  %v2538_v60 = vpack.c.bf16 %v2025_v31, %v2023_v15  ;;  %v2068_v3 = vpop.permute.xlu1 %2067 }
 0x44d   : > { %v2026_v32 = vmul.f32 %v4167_v1, %v1988_v29  ;;  %v2073_v45 = vpop.permute.xlu0 %2072 }
 0x44e   : > { %v2027_v8 = vmul.f32 %v4170_v7, %v1990_v5  ;;  %v1993_v37 = vpop.f32.mrb[26].mxu0  ;;  %2539 = vmatprep.subr.bf16.mxu0 %v2538_v60 }
 0x44f   : > { %v1994_v55 = vadd.f32 %v1993_v37, %v1881_v63  ;;  %v1995_v51 = vpop.f32.mrb[27].mxu0  ;;  %2541 = vmatpush1.bf16.msra.mxu0 %v2540_v57 }
 0x450   : > { %v1996_v24 = vadd.f32 %v1995_v51, %v1883_v21  ;;  %v2078_v60 = vpop.permute.xlu1 %2077 }
 0x451   : > { %v2028_v43 = vmul.f32 %v4167_v1, %v1994_v55  ;;  %v2083_v37 = vpop.permute.xlu0 %2082 }
 0x452   : > { %v2029_v4 = vmul.f32 %v4170_v7, %v1996_v24  ;;  %v1999_v25 = vpop.f32.mrb[28].mxu0  ;;  %v2005_v52 = vpop.f32.mrb[16].mxu1 }
 0x453   : > { %v2544_v11 = vpack.c.bf16 %v2028_v43, %v2026_v32  ;;  %v2000_v12 = vadd.f32 %v1999_v25, %v1887_v41  ;;  %v2582_v48 = vadd.f32 %v2005_v52, %v1758_v42  ;;  %v2001_v26 = vpop.f32.mrb[29].mxu0  ;;  %v2007_v50 = vpop.f32.mrb[17].mxu1 }
 0x454   : > { %v2002_v54 = vadd.f32 %v2001_v26, %v1889_v23  ;;  %v2583_v38 = vadd.f32 %v2007_v50, %v1758_v42  ;;  %v2542_v27 = vpack.c.bf16 %v2029_v4, %v2027_v8  ;;  %v2088_v42 = vpop.permute.xlu1 %2087 }
 0x455   : > { %v2030_v16 = vmul.f32 %v4167_v1, %v2000_v12  ;;  %v2032_v53 = vmul.f32 %v2582_v48, %v4167_v1  ;;  %v2036_v1 = vld [vmem:[#allocation11 + $0x10] sm:$0xff] }
 0x456   : > { %v2031_v36 = vmul.f32 %v4170_v7, %v2002_v54  ;;  %v2033_v35 = vmul.f32 %v2583_v38, %v4170_v7  ;;  %2543 = vmatprep.subr.bf16.mxu0 %v2542_v27  ;;  %v2037_v7 = vld [vmem:[#allocation11 + $0x18] sm:$0xff] }
 0x457   : > { %v2548_v56 = vpack.c.bf16 %v2032_v53, %v2030_v16  ;;  %2545 = vmatpush1.bf16.msra.mxu0 %v2544_v11 }
 0x458   : > { %v2546_v40 = vpack.c.bf16 %v2033_v35, %v2031_v36 }
 0x45a   : > { %2547 = vmatprep.subr.bf16.mxu0 %v2546_v40 }
 0x45b   : > { %2549 = vmatpush1.bf16.msra.mxu0 %v2548_v56 }
 0x45e   : > { %2423 = vmatmul.mubr.msk.f32.vlgmr.msra.gmra.mrb[30].mxu0 %vm2090_vm1, %v2034_v39 }
 0x45f   : > { %2185 = vmatprep.mubr.f32.mxu0 %v4344_v18 }
 0x462   : > { %2424 = vmatmul.mubr.msk.f32.gmra.mrb[32].mxu0 %vm2090_vm1, %v2035_v62 }
 0x463   : > { %2191 = vmatprep.mubr.f32.mxu0 %v4344_v18 }
 0x466   : > { %2425 = vmatmul.mubr.msk.f32.gmra.mrb[34].mxu0 %vm2090_vm1, %v2036_v1 }
 0x467   : > { %2197 = vmatprep.mubr.f32.mxu0 %v4344_v18 }
 0x46a   : > { %2426 = vmatmul.mubr.msk.f32.gmra.mrb[36].mxu0 %vm2090_vm1, %v2037_v7 }
 0x46b   : > { %2203 = vmatprep.mubr.f32.mxu0 %v4344_v18 }
 0x46e   : > { %2427 = vmatmul.mubr.msk.f32.gmra.mrb[38].mxu0 %vm2090_vm1, %v2038_v0 }
 0x46f   : > { %2209 = vmatprep.mubr.f32.mxu0 %v4344_v18 }
 0x472   : > { %2428 = vmatmul.mubr.msk.f32.gmra.mrb[40].mxu0 %vm2090_vm1, %v2039_v17 }
 0x473   : > { %2215 = vmatprep.mubr.f32.mxu0 %v4344_v18 }
 0x476   : > { %2429 = vmatmul.mubr.msk.f32.gmra.mrb[42].mxu0 %vm2090_vm1, %v2040_v10 }
 0x477   : > { %2221 = vmatprep.mubr.f32.mxu0 %v4344_v18 }
 0x47a   : > { %2430 = vmatmul.mubr.msk.f32.gmra.mrb[44].mxu0 %vm2090_vm1, %v2041_v59 }
 0x531   : > { %v2181_v6 = vpop.f32.mrb[30].mxu0 }
 0x532   : > { %v2182_v20 = vadd.f32 %v2181_v6, %v2053_v22  ;;  %v2183_v13 = vpop.f32.mrb[31].mxu0 }
 0x533   : > { %v2184_v19 = vadd.f32 %v2183_v13, %v2053_v22 }
 0x534   : > { %2228 = vst [vmem:[%s4205_s15] sm:$0xff] %v2182_v20 }
 0x535   : > { %2229 = vst [vmem:[%s4205_s15 + $0x8] sm:$0xff] %v2184_v19  ;;  %v2187_v18 = vpop.f32.mrb[32].mxu0 }
 0x536   : > { %v2188_v15 = vadd.f32 %v2187_v18, %v2058_v58  ;;  %v2189_v33 = vpop.f32.mrb[33].mxu0 }
 0x537   : > { %v2190_v34 = vadd.f32 %v2189_v33, %v2058_v58 }
 0x538   : > { %2230 = vst [vmem:[%s4205_s15 + $0x10] sm:$0xff] %v2188_v15 }
 0x539   : > { %2231 = vst [vmem:[%s4205_s15 + $0x18] sm:$0xff] %v2190_v34  ;;  %v2193_v49 = vpop.f32.mrb[34].mxu0 }
 0x53a   : > { %v2194_v9 = vadd.f32 %v2193_v49, %v2063_v14  ;;  %v2195_v44 = vpop.f32.mrb[35].mxu0 }
 0x53b   : > { %v2196_v2 = vadd.f32 %v2195_v44, %v2063_v14 }
 0x53c   : > { %2232 = vst [vmem:[%s4205_s15 + $0x20] sm:$0xff] %v2194_v9 }
 0x53d   : > { %2233 = vst [vmem:[%s4205_s15 + $0x28] sm:$0xff] %v2196_v2  ;;  %v2199_v30 = vpop.f32.mrb[36].mxu0 }
 0x53e   : > { %v2200_v46 = vadd.f32 %v2199_v30, %v2068_v3  ;;  %v2201_v31 = vpop.f32.mrb[37].mxu0 }
 0x53f   : > { %v2202_v28 = vadd.f32 %v2201_v31, %v2068_v3 }
 0x540   : > { %2234 = vst [vmem:[%s4205_s15 + $0x30] sm:$0xff] %v2200_v46 }
 0x541   : > { %2235 = vst [vmem:[%s4205_s15 + $0x38] sm:$0xff] %v2202_v28  ;;  %v2205_v57 = vpop.f32.mrb[38].mxu0 }
 0x542   : > { %v2206_v29 = vadd.f32 %v2205_v57, %v2073_v45  ;;  %v2207_v47 = vpop.f32.mrb[39].mxu0 }
 0x543   : > { %v2208_v5 = vadd.f32 %v2207_v47, %v2073_v45 }
 0x544   : > { %2236 = vst [vmem:[%s4205_s15 + $0x40] sm:$0xff] %v2206_v29 }
 0x545   : > { %2237 = vst [vmem:[%s4205_s15 + $0x48] sm:$0xff] %v2208_v5  ;;  %v2211_v63 = vpop.f32.mrb[40].mxu0 }
 0x546   : > { %v2212_v32 = vadd.f32 %v2211_v63, %v2078_v60  ;;  %v2213_v21 = vpop.f32.mrb[41].mxu0 }
 0x547   : > { %v2214_v8 = vadd.f32 %v2213_v21, %v2078_v60 }
 0x548   : > { %2238 = vst [vmem:[%s4205_s15 + $0x50] sm:$0xff] %v2212_v32 }
 0x549   : > { %2239 = vst [vmem:[%s4205_s15 + $0x58] sm:$0xff] %v2214_v8  ;;  %v2217_v55 = vpop.f32.mrb[42].mxu0 }
 0x54a   : > { %v2218_v51 = vadd.f32 %v2217_v55, %v2083_v37  ;;  %v2219_v61 = vpop.f32.mrb[43].mxu0 }
 0x54b   : > { %v2220_v24 = vadd.f32 %v2219_v61, %v2083_v37 }
 0x54c   : > { %2240 = vst [vmem:[%s4205_s15 + $0x60] sm:$0xff] %v2218_v51 }
 0x54d   : > { %2241 = vst [vmem:[%s4205_s15 + $0x68] sm:$0xff] %v2220_v24  ;;  %v2223_v41 = vpop.f32.mrb[44].mxu0 }
 0x54e   : > { %v2224_v43 = vadd.f32 %v2223_v41, %v2088_v42  ;;  %v2225_v23 = vpop.f32.mrb[45].mxu0 }
 0x54f   : > { %v2226_v4 = vadd.f32 %v2225_v23, %v2088_v42 }
 0x550   : > { %2242 = vst [vmem:[%s4205_s15 + $0x70] sm:$0xff] %v2224_v43 }
 0x551   : > { %2243 = vst [vmem:[%s4205_s15 + $0x78] sm:$0xff] %v2226_v4 }
 0x552   : > { %2850 = shalt.err (!%p2847_p9)
}
 0x553   : > { %s2851_s30 = scalar_lea.hbm %s4226_s10, 2048  ;;  %s2855_s28 = scalar_lea.hbm %s4348_s12, 4096 }
 0x554   : > { %p2852_p0 = scmp.ne.s32.totalorder %s4226_s10, %s2851_s30  ;;  %p2856_p13 = scmp.lt.u32.totalorder %s4226_s10, %s4348_s12 }
 0x555   : > { %p2857_p6 = scmp.lt.u32.totalorder %s2855_s28, %s2851_s30  ;;  %p2859_p3 = scmp.lt.u32.totalorder %s2851_s30, %s4226_s10 }
 0x556   : > { %p2853_p11 = pnand %p2852_p0, %p3142_p5 }
 0x557   : > { %p2858_p10 = por %p2857_p6, %p2856_p13 }
 0x558   : > { %p2854_p8 = pneg %p2853_p11 }
 0x559   : > { %p2860_p7 = por %p2859_p3, %p2858_p10 }
 0x55b   : > { %p2861_p12 = pnand %p2860_p7, %p2854_p8 }
 0x55d   : > { %2864 = shalt.err (!%p2861_p12)
}
 0x55e   : > { %s2933_s13 = smov 256  }
 0x55f   : > { %2600 = dma.vmem_to_hbm [thread:$0]  (%p3142_p5), %s4228_s24, 2048, %s4226_s10, %s2245_s6, %s2933_s13, %s2933_s13, %s2923_s16  }
 0x560 PF: > { %s4349_s14 = sld [smem:[#allocation18_spill]]  ;;  %s4350_s19 = sld [smem:[#allocation19_spill]] }
 0x561   : > { %p4352_p2 = scmp.ge.s32.totalorder %s2911_s22, 2 }
 0x566   : > { %s2273_s27 = sand.u32 1, %s4349_s14   ;;  %p4351_p1 = scmp.ne.s32.totalorder %s4350_s19, 0 }
 0x567   : > { %s2274_s30 = scalar_lea.sflag [#allocation7], %s2273_s27 }
 0x568   : > { %p2617_p4 = pnand %p4352_p2, %p4351_p1 }
 0x56a   : > { %2894 = dma.done.wait (!%p2617_p4), %s2274_s30, 2048  }
 0x56b   : > { %2896 = vsyncadd (!%p2617_p4), %s2274_s30, 4294965248  ;;  %p28_p9 = scmp.ge.s32.totalorder %s3110_s23, 4   ;;  %s4353_s19 = smov %s2903_s20 }
 0x56c   : > { %s4354_s20 = smov %s2907_s21  ;;  %s4355_s21 = smov %s3138_s29 }
 0x56d   : > { %s4356_s22 = smov %s3110_s23  ;;  %30 = sbr.rel (!%p28_p9) target bundleno = 11 (0xb), region = 126 }
 0x574   :  { %2279 = vsyncpa [#allocation6], 1 }
 0x575   :  { %2281 = vsyncpa [#allocation6 + $0x1], 1 }
 0x576   :  { %2282 = vsyncpa [#allocation9], 1 }
 0x577   :  { %2283 = vsyncpa [#allocation12], 1 }
 0x578   :  { %2284 = vsyncpa [#allocation7], 1 }
 0x579   :  { %2286 = vsyncpa [#allocation7 + $0x1], 1 }

</bundles_post_ra>
